<compile_context>
chip_gen: v6e
topology: v6e:2x2x1
jax: 0.10.0
libtpu: 0.0.40
codegen_flags: <defaults>
</compile_context>

<pallas_src>
import functools

import jax
import jax.numpy as jnp
from jax import lax
from jax.experimental import pallas as pl
from jax.experimental.pallas import tpu as pltpu

_LANE = 128        # TPU lane width
_STAT_ROWS = 16    # per-tile statistics block rows (sublane aligned)


def _leaky_relu(x, slope=0.01):
    # torch.nn.functional.leaky_relu default negative_slope = 0.01
    return jnp.where(x >= 0, x, slope * x)


def _round_up(x, m):
    return (x + m - 1) // m * m


def _l2_kernel(scal_ref,                                   # SMEM (4,): alpha0, beta0, gamma0, dt
               x_ref,                                      # VMEM (2, TN)    rows = u0, s0
               w1_ref, b1_ref,                             # (h1, 2), (h1, 1)
               w2_ref, b2_ref,                             # (h2, h1), (h2, 1)
               w3_ref, b3_ref,                             # (3, h2), (3, 1)
               out_ref,                                    # (8, TN) packed output slab
               stats_ref=None,                             # (16, 128) per-tile stats (ratio != 0)
               *, n_cells, with_cost):
    alpha0 = scal_ref[0]
    beta0 = scal_ref[1]
    gamma0 = scal_ref[2]
    dt = scal_ref[3]

    x = x_ref[...]                                         # (2, TN)
    tn = x.shape[1]
    u0 = x[0:1, :]                                         # (1, TN)
    s0 = x[1:2, :]                                         # (1, TN)

    # --- layer 1 (2 -> h1): K=2 is a sliver for the MXU; do it on the VPU. ---
    w1 = w1_ref[...]                                       # (h1, 2)
    h = w1[:, 0:1] * u0 + w1[:, 1:2] * s0 + b1_ref[...]    # (h1, TN), lane-dense
    h = _leaky_relu(h)

    # --- layer 2 (h1 -> h2): the real matmul, N on the lane axis. ---
    h = jnp.dot(w2_ref[...], h, preferred_element_type=jnp.float32) + b2_ref[...]
    h = _leaky_relu(h)

    # --- layer 3 (h2 -> 3) ---
    o = jnp.dot(w3_ref[...], h, preferred_element_type=jnp.float32) + b3_ref[...]
    # sigmoid: exp goes to the EUP, exact reciprocal keeps parity with the reference
    o = pl.reciprocal(1.0 + jnp.exp(-o), approx=False)     # (3, TN)

    beta = o[0:1, :] * beta0
    gamma = o[1:2, :] * gamma0
    alphas = o[2:3, :] * alpha0

    u1 = u0 + (alphas - beta * u0) * dt
    s1 = s0 + (beta * u0 - gamma * s0) * dt

    # One lane-dense (8, TN) store instead of five masked (N, 1) outputs.
    pad = jnp.zeros_like(u0)
    out_ref[...] = jnp.concatenate(
        [u1, s1, alphas, beta, gamma, pad, pad, pad], axis=0)

    if with_cost:
        # Tile-centered Pearson statistics (lane-axis reductions); the global
        # correlation is finalized in the JAX wrapper, so the grid stays parallel.
        lane = lax.broadcasted_iota(jnp.int32, (1, tn), 1)
        idx = pl.program_id(0) * tn + lane
        m = (idx < n_cells).astype(jnp.float32)            # (1, TN) valid-cell mask

        def rsum(v):                                       # lane reduction -> (1, 1)
            return jnp.sum(v, axis=1, keepdims=True)

        cnt = rsum(m)                                      # valid cells in this tile (>= 1)
        ma = rsum(alphas * m) / cnt
        mu = rsum(u0 * m) / cnt
        mb = rsum(beta * m) / cnt
        ms = rsum(s0 * m) / cnt
        ac = (alphas - ma) * m
        uc = (u0 - mu) * m
        bc = (beta - mb) * m
        sc = (s0 - ms) * m

        zeros = jnp.zeros((_STAT_ROWS - 11, 1), jnp.float32)
        stats = jnp.concatenate(
            [cnt, ma, mu, rsum(ac * uc), rsum(ac * ac), rsum(uc * uc),
             mb, ms, rsum(bc * sc), rsum(bc * bc), rsum(sc * sc), zeros],
            axis=0)                                        # (16, 1)
        stats_ref[...] = jnp.broadcast_to(stats, (_STAT_ROWS, _LANE))


def init_params(key, h1, h2):
    """PyTorch nn.Linear default init; weights kept in torch layout (out, in)."""
    def linear(k, fan_in, fan_out):
        kw, kb = jax.random.split(k)
        bound = 1.0 / jnp.sqrt(jnp.float32(fan_in))
        w = jax.random.uniform(kw, (fan_out, fan_in), jnp.float32, -bound, bound)
        b = jax.random.uniform(kb, (fan_out,), jnp.float32, -bound, bound)
        return w, b

    k1, k2, k3 = jax.random.split(key, 3)
    w1, b1 = linear(k1, 2, h1)
    w2, b2 = linear(k2, h1, h2)
    w3, b3 = linear(k3, h2, 3)
    return (w1, b1, w2, b2, w3, b3)


def l2module_forward(u0, s0, alpha0, beta0, gamma0, dt, params, ratio, *, tile_n=512):
    """Pallas TPU implementation of L2Module.forward.

    tile_n: cells per grid step (lane axis). Multiples of 256 (>= 512) suit the
    v6e/v7x 256-wide MXU; 128-multiples suffice on v5e. The per-tile working set
    is tiny, so the default fits every generation's scoped-VMEM budget.
    """
    w1, b1, w2, b2, w3, b3 = params                        # torch layout (out, in)
    h1, h2 = w1.shape[0], w2.shape[0]
    n = u0.shape[0]
    with_cost = (ratio != 0)

    tn = min(int(tile_n), _round_up(n, _LANE))
    tn = _round_up(tn, _LANE)
    n_pad = _round_up(n, tn)
    n_tiles = n_pad // tn

    # feature-major, zero-padded input
    x = jnp.stack([u0, s0], axis=0).astype(jnp.float32)    # (2, N)
    x = jnp.pad(x, ((0, 0), (0, n_pad - n)))

    scal = jnp.asarray([alpha0, beta0, gamma0, dt], dtype=jnp.float32)
    b1c = b1.reshape(h1, 1).astype(jnp.float32)
    b2c = b2.reshape(h2, 1).astype(jnp.float32)
    b3c = b3.reshape(3, 1).astype(jnp.float32)

    def resident(shape):                                   # same block every step -> stays in VMEM
        return pl.BlockSpec(shape, lambda i: (0, 0))

    in_specs = [
        pl.BlockSpec(memory_space=pltpu.MemorySpace.SMEM),  # alpha0/beta0/gamma0/dt
        pl.BlockSpec((2, tn), lambda i: (0, i)),            # x tile
        resident((h1, 2)), resident((h1, 1)),
        resident((h2, h1)), resident((h2, 1)),
        resident((3, h2)), resident((3, 1)),
    ]

    out_shapes = [jax.ShapeDtypeStruct((8, n_pad), jnp.float32)]
    out_specs = [pl.BlockSpec((8, tn), lambda i: (0, i))]
    if with_cost:
        out_shapes.append(
            jax.ShapeDtypeStruct((n_tiles * _STAT_ROWS, _LANE), jnp.float32))
        out_specs.append(pl.BlockSpec((_STAT_ROWS, _LANE), lambda i: (i, 0)))

    kernel = functools.partial(_l2_kernel, n_cells=n, with_cost=with_cost)

    outs = pl.pallas_call(
        kernel,
        grid=(n_tiles,),
        in_specs=in_specs,
        out_specs=tuple(out_specs),
        out_shape=tuple(out_shapes),
        compiler_params=pltpu.CompilerParams(
            dimension_semantics=("parallel",),             # shard tiles across TCs (v7x)
            vmem_limit_bytes=32 * 1024 * 1024,             # explicit, fits v5e/v6e/v7x
        ),
    )(scal, x,
      w1.astype(jnp.float32), b1c,
      w2.astype(jnp.float32), b2c,
      w3.astype(jnp.float32), b3c)

    slab = outs[0]
    u1 = slab[0, :n]
    s1 = slab[1, :n]
    alphas = slab[2, :n]
    beta = slab[3, :n]
    gamma = slab[4, :n]

    if not with_cost:
        cost = jnp.float32(0.0)
    else:
        st = outs[1].reshape(n_tiles, _STAT_ROWS, _LANE)[:, :, 0]   # (n_tiles, 16)
        cnt = st[:, 0]
        n_tot = jnp.sum(cnt)

        def corr_from_tiles(mean_a, mean_b, cab, caa, cbb):
            # Exact combination of tile-centered stats into global centered sums.
            ga = jnp.sum(cnt * mean_a) / n_tot
            gb = jnp.sum(cnt * mean_b) / n_tot
            da = mean_a - ga
            db = mean_b - gb
            num = jnp.sum(cab + cnt * da * db)
            va = jnp.sum(caa + cnt * da * da)
            vb = jnp.sum(cbb + cnt * db * db)
            return num / jnp.sqrt(va * vb)

        corr = (corr_from_tiles(st[:, 1], st[:, 2], st[:, 3], st[:, 4], st[:, 5]) +
                corr_from_tiles(st[:, 6], st[:, 7], st[:, 8], st[:, 9], st[:, 10]))
        cost = jnp.where(corr >= 0.0, jnp.float32(0.0), -corr)

    return u1, s1, alphas, beta, gamma, cost


def _reference_forward(u0, s0, alpha0, beta0, gamma0, dt, params, ratio):
    """Pure-JAX reference mirroring the PyTorch forward (torch weight layout)."""
    w1, b1, w2, b2, w3, b3 = params
    x = jnp.stack([u0, s0], axis=1)
    h = _leaky_relu(x @ w1.T + b1)
    h = _leaky_relu(h @ w2.T + b2)
    o = jax.nn.sigmoid(h @ w3.T + b3)
    beta = o[:, 0] * beta0
    gamma = o[:, 1] * gamma0
    alphas = o[:, 2] * alpha0
    u1 = u0 + (alphas - beta * u0) * dt
    s1 = s0 + (beta * u0 - gamma * s0) * dt

    def corr(a, b):
        ac = a - a.mean()
        bc = b - b.mean()
        return (ac * bc).sum() / jnp.sqrt((ac * ac).sum() * (bc * bc).sum())

    if ratio == 0:
        cost = jnp.float32(0.0)
    else:
        c = corr(alphas, u0) + corr(beta, s0)
        cost = jnp.where(c >= 0.0, jnp.float32(0.0), -c)
    return u1, s1, alphas, beta, gamma, cost


if __name__ == "__main__":
    key = jax.random.PRNGKey(0)
    k_u, k_s, k_p = jax.random.split(key, 3)

    # 1000 cells (not a tile multiple -> exercises masking / multi-tile path)
    N, H1, H2 = 1000, 32, 32
    u0 = jnp.abs(jax.random.normal(k_u, (N,), jnp.float32))
    s0 = jnp.abs(jax.random.normal(k_s, (N,), jnp.float32))
    alpha0, beta0, gamma0, dt = 1.5, 0.8, 0.6, 0.5
    ratio = 1

    params = init_params(k_p, H1, H2)

    out = l2module_forward(u0, s0, alpha0, beta0, gamma0, dt, params, ratio,
                           tile_n=512)
    out = jax.block_until_ready(out)

    ref = _reference_forward(u0, s0, alpha0, beta0, gamma0, dt, params, ratio)
    names = ("u1", "s1", "alphas", "beta", "gamma", "cost")
    for nm, a, b in zip(names, out, ref):
        assert jnp.allclose(a, b, rtol=1e-4, atol=1e-5), (nm, a, b)

    # ratio == 0 fast path: kernel variant with no correlation work compiled.
    out0 = l2module_forward(u0, s0, alpha0, beta0, gamma0, dt, params, 0)
    out0 = jax.block_until_ready(out0)
    assert float(out0[5]) == 0.0
    for nm, a, b in zip(names[:5], out0[:5], ref[:5]):
        assert jnp.allclose(a, b, rtol=1e-4, atol=1e-5), (nm, a, b)

    print("KERNEL_OK")
</pallas_src>

<mosaic_0001>
module attributes {stable_mosaic.version = 11 : i64} {
  func.func @_l2_kernel(%arg0: i32, %arg1: memref<4xf32, #tpu.memory_space<smem>>, %arg2: memref<2x512xf32, #tpu.memory_space<vmem>>, %arg3: memref<32x2xf32, #tpu.memory_space<vmem>>, %arg4: memref<32x1xf32, #tpu.memory_space<vmem>>, %arg5: memref<32x32xf32, #tpu.memory_space<vmem>>, %arg6: memref<32x1xf32, #tpu.memory_space<vmem>>, %arg7: memref<3x32xf32, #tpu.memory_space<vmem>>, %arg8: memref<3x1xf32, #tpu.memory_space<vmem>>, %arg9: memref<8x512xf32, #tpu.memory_space<vmem>>, %arg10: memref<16x128xf32, #tpu.memory_space<vmem>>) attributes {dimension_semantics = [#tpu.dimension_semantics<parallel>], iteration_bounds = array<i64: 2>, scalar_prefetch = 0 : i64, scratch_operands = 0 : i64, tpu.core_type = #tpu.core_type<tc>, window_params = [{transform_indices = @transform_0, window_bounds = array<i64: 4>}, {transform_indices = @transform_1, window_bounds = array<i64: 2, 512>}, {pipeline_mode = #tpu.pipeline_mode<synchronous>, transform_indices = @transform_2, window_bounds = array<i64: 32, 2>}, {pipeline_mode = #tpu.pipeline_mode<synchronous>, transform_indices = @transform_3, window_bounds = array<i64: 32, 1>}, {pipeline_mode = #tpu.pipeline_mode<synchronous>, transform_indices = @transform_4, window_bounds = array<i64: 32, 32>}, {pipeline_mode = #tpu.pipeline_mode<synchronous>, transform_indices = @transform_5, window_bounds = array<i64: 32, 1>}, {pipeline_mode = #tpu.pipeline_mode<synchronous>, transform_indices = @transform_6, window_bounds = array<i64: 3, 32>}, {pipeline_mode = #tpu.pipeline_mode<synchronous>, transform_indices = @transform_7, window_bounds = array<i64: 3, 1>}, {transform_indices = @transform_8, window_bounds = array<i64: 8, 512>}, {transform_indices = @transform_9, window_bounds = array<i64: 16, 128>}]} {
    %c0 = arith.constant 0 : index
    %0 = memref.load %arg1[%c0] : memref<4xf32, #tpu.memory_space<smem>>
    %c1 = arith.constant 1 : index
    %1 = memref.load %arg1[%c1] : memref<4xf32, #tpu.memory_space<smem>>
    %c2 = arith.constant 2 : index
    %2 = memref.load %arg1[%c2] : memref<4xf32, #tpu.memory_space<smem>>
    %c3 = arith.constant 3 : index
    %3 = memref.load %arg1[%c3] : memref<4xf32, #tpu.memory_space<smem>>
    %c0_0 = arith.constant 0 : index
    %c0_1 = arith.constant 0 : index
    %4 = vector.load %arg2[%c0_0, %c0_1] : memref<2x512xf32, #tpu.memory_space<vmem>>, vector<2x512xf32>
    %5 = vector.extract_strided_slice %4 {offsets = [0, 0], sizes = [1, 512], strides = [1, 1]} : vector<2x512xf32> to vector<1x512xf32>
    %6 = vector.extract_strided_slice %4 {offsets = [1, 0], sizes = [1, 512], strides = [1, 1]} : vector<2x512xf32> to vector<1x512xf32>
    %c0_2 = arith.constant 0 : index
    %c0_3 = arith.constant 0 : index
    %7 = vector.load %arg3[%c0_2, %c0_3] : memref<32x2xf32, #tpu.memory_space<vmem>>, vector<32x2xf32>
    %8 = vector.extract_strided_slice %7 {offsets = [0, 0], sizes = [32, 1], strides = [1, 1]} : vector<32x2xf32> to vector<32x1xf32>
    %9 = vector.broadcast %8 : vector<32x1xf32> to vector<32x512xf32>
    %10 = vector.broadcast %5 : vector<1x512xf32> to vector<32x512xf32>
    %11 = arith.mulf %9, %10 : vector<32x512xf32>
    %12 = vector.extract_strided_slice %7 {offsets = [0, 1], sizes = [32, 1], strides = [1, 1]} : vector<32x2xf32> to vector<32x1xf32>
    %13 = vector.broadcast %12 : vector<32x1xf32> to vector<32x512xf32>
    %14 = vector.broadcast %6 : vector<1x512xf32> to vector<32x512xf32>
    %15 = arith.mulf %13, %14 : vector<32x512xf32>
    %16 = arith.addf %11, %15 : vector<32x512xf32>
    %c0_4 = arith.constant 0 : index
    %c0_5 = arith.constant 0 : index
    %17 = vector.load %arg4[%c0_4, %c0_5] : memref<32x1xf32, #tpu.memory_space<vmem>>, vector<32x1xf32>
    %18 = vector.broadcast %17 : vector<32x1xf32> to vector<32x512xf32>
    %19 = arith.addf %16, %18 : vector<32x512xf32>
    %cst = arith.constant 0.000000e+00 : f32
    %20 = vector.broadcast %cst : f32 to vector<32x512xf32>
    %21 = arith.cmpf oge, %19, %20 : vector<32x512xf32>
    %cst_6 = arith.constant 0.00999999977 : f32
    %22 = vector.broadcast %cst_6 : f32 to vector<32x512xf32>
    %23 = arith.mulf %22, %19 : vector<32x512xf32>
    %24 = arith.select %21, %19, %23 : vector<32x512xi1>, vector<32x512xf32>
    %c0_7 = arith.constant 0 : index
    %c0_8 = arith.constant 0 : index
    %25 = vector.load %arg5[%c0_7, %c0_8] : memref<32x32xf32, #tpu.memory_space<vmem>>, vector<32x32xf32>
    %cst_9 = arith.constant dense<0.000000e+00> : vector<32x512xf32>
    %26 = tpu.matmul %25, %24, %cst_9 {dimension_numbers = #tpu.dot_dimension_numbers<[1], [0], [0], [1], [0, 0, 1, 1], [], []>} : vector<32x32xf32>, vector<32x512xf32>, vector<32x512xf32> -> vector<32x512xf32>
    %c0_10 = arith.constant 0 : index
    %c0_11 = arith.constant 0 : index
    %27 = vector.load %arg6[%c0_10, %c0_11] : memref<32x1xf32, #tpu.memory_space<vmem>>, vector<32x1xf32>
    %28 = vector.broadcast %27 : vector<32x1xf32> to vector<32x512xf32>
    %29 = arith.addf %26, %28 : vector<32x512xf32>
    %cst_12 = arith.constant 0.000000e+00 : f32
    %30 = vector.broadcast %cst_12 : f32 to vector<32x512xf32>
    %31 = arith.cmpf oge, %29, %30 : vector<32x512xf32>
    %cst_13 = arith.constant 0.00999999977 : f32
    %32 = vector.broadcast %cst_13 : f32 to vector<32x512xf32>
    %33 = arith.mulf %32, %29 : vector<32x512xf32>
    %34 = arith.select %31, %29, %33 : vector<32x512xi1>, vector<32x512xf32>
    %c0_14 = arith.constant 0 : index
    %c0_15 = arith.constant 0 : index
    %35 = vector.load %arg7[%c0_14, %c0_15] : memref<3x32xf32, #tpu.memory_space<vmem>>, vector<3x32xf32>
    %cst_16 = arith.constant dense<0.000000e+00> : vector<3x512xf32>
    %36 = tpu.matmul %35, %34, %cst_16 {dimension_numbers = #tpu.dot_dimension_numbers<[1], [0], [0], [1], [0, 0, 1, 1], [], []>} : vector<3x32xf32>, vector<32x512xf32>, vector<3x512xf32> -> vector<3x512xf32>
    %c0_17 = arith.constant 0 : index
    %c0_18 = arith.constant 0 : index
    %37 = vector.load %arg8[%c0_17, %c0_18] : memref<3x1xf32, #tpu.memory_space<vmem>>, vector<3x1xf32>
    %38 = vector.broadcast %37 : vector<3x1xf32> to vector<3x512xf32>
    %39 = arith.addf %36, %38 : vector<3x512xf32>
    %cst_19 = arith.constant 0.000000e+00 : f32
    %40 = vector.broadcast %cst_19 : f32 to vector<3x512xf32>
    %41 = arith.subf %40, %39 : vector<3x512xf32>
    %42 = math.exp %41 : vector<3x512xf32>
    %cst_20 = arith.constant 1.000000e+00 : f32
    %43 = vector.broadcast %cst_20 : f32 to vector<3x512xf32>
    %44 = arith.addf %43, %42 : vector<3x512xf32>
    %45 = tpu.reciprocal %44 : vector<3x512xf32> -> vector<3x512xf32>
    %46 = vector.extract_strided_slice %45 {offsets = [0, 0], sizes = [1, 512], strides = [1, 1]} : vector<3x512xf32> to vector<1x512xf32>
    %47 = vector.broadcast %1 : f32 to vector<1x512xf32>
    %48 = arith.mulf %46, %47 : vector<1x512xf32>
    %49 = vector.extract_strided_slice %45 {offsets = [1, 0], sizes = [1, 512], strides = [1, 1]} : vector<3x512xf32> to vector<1x512xf32>
    %50 = vector.broadcast %2 : f32 to vector<1x512xf32>
    %51 = arith.mulf %49, %50 : vector<1x512xf32>
    %52 = vector.extract_strided_slice %45 {offsets = [2, 0], sizes = [1, 512], strides = [1, 1]} : vector<3x512xf32> to vector<1x512xf32>
    %53 = vector.broadcast %0 : f32 to vector<1x512xf32>
    %54 = arith.mulf %52, %53 : vector<1x512xf32>
    %55 = arith.mulf %48, %5 : vector<1x512xf32>
    %56 = arith.subf %54, %55 : vector<1x512xf32>
    %57 = vector.broadcast %3 : f32 to vector<1x512xf32>
    %58 = arith.mulf %56, %57 : vector<1x512xf32>
    %59 = arith.addf %5, %58 : vector<1x512xf32>
    %60 = arith.mulf %48, %5 : vector<1x512xf32>
    %61 = arith.mulf %51, %6 : vector<1x512xf32>
    %62 = arith.subf %60, %61 : vector<1x512xf32>
    %63 = vector.broadcast %3 : f32 to vector<1x512xf32>
    %64 = arith.mulf %62, %63 : vector<1x512xf32>
    %65 = arith.addf %6, %64 : vector<1x512xf32>
    %cst_21 = arith.constant 0.000000e+00 : f32
    %66 = vector.broadcast %cst_21 : f32 to vector<1x512xf32>
    %67 = tpu.concatenate %59, %65, %54, %48, %51, %66, %66, %66 in 0 : vector<1x512xf32>, vector<1x512xf32>, vector<1x512xf32>, vector<1x512xf32>, vector<1x512xf32>, vector<1x512xf32>, vector<1x512xf32>, vector<1x512xf32> -> vector<8x512xf32>
    %c0_22 = arith.constant 0 : index
    %c0_23 = arith.constant 0 : index
    %68 = vector.load %arg9[%c0_22, %c0_23] : memref<8x512xf32, #tpu.memory_space<vmem>>, vector<8x512xf32>
    tpu.vector_store %arg9[%c0_22, %c0_23], %67 {strides = array<i32>} : memref<8x512xf32, #tpu.memory_space<vmem>>, vector<8x512xf32>,
    %69 = tpu.iota {dimensions = array<i32: 1>} : vector<1x512xi32>
    %c512_i32 = arith.constant 512 : i32
    %70 = arith.muli %arg0, %c512_i32 : i32
    %71 = vector.broadcast %70 : i32 to vector<1x512xi32>
    %72 = arith.addi %71, %69 : vector<1x512xi32>
    %c1000_i32 = arith.constant 1000 : i32
    %73 = vector.broadcast %c1000_i32 : i32 to vector<1x512xi32>
    %74 = arith.cmpi slt, %72, %73 : vector<1x512xi32>
    %75 = arith.extui %74 : vector<1x512xi1> to vector<1x512xi32>
    %76 = arith.sitofp %75 : vector<1x512xi32> to vector<1x512xf32>
    %cst_24 = arith.constant dense<0.000000e+00> : vector<1xf32>
    %77 = vector.multi_reduction <add>, %76, %cst_24 [1] : vector<1x512xf32> to vector<1xf32>
    %78 = vector.shape_cast %77 : vector<1xf32> to vector<1x1xf32>
    %79 = arith.mulf %54, %76 : vector<1x512xf32>
    %cst_25 = arith.constant dense<0.000000e+00> : vector<1xf32>
    %80 = vector.multi_reduction <add>, %79, %cst_25 [1] : vector<1x512xf32> to vector<1xf32>
    %81 = vector.shape_cast %80 : vector<1xf32> to vector<1x1xf32>
    %82 = arith.divf %81, %78 : vector<1x1xf32>
    %83 = arith.mulf %5, %76 : vector<1x512xf32>
    %cst_26 = arith.constant dense<0.000000e+00> : vector<1xf32>
    %84 = vector.multi_reduction <add>, %83, %cst_26 [1] : vector<1x512xf32> to vector<1xf32>
    %85 = vector.shape_cast %84 : vector<1xf32> to vector<1x1xf32>
    %86 = arith.divf %85, %78 : vector<1x1xf32>
    %87 = arith.mulf %48, %76 : vector<1x512xf32>
    %cst_27 = arith.constant dense<0.000000e+00> : vector<1xf32>
    %88 = vector.multi_reduction <add>, %87, %cst_27 [1] : vector<1x512xf32> to vector<1xf32>
    %89 = vector.shape_cast %88 : vector<1xf32> to vector<1x1xf32>
    %90 = arith.divf %89, %78 : vector<1x1xf32>
    %91 = arith.mulf %6, %76 : vector<1x512xf32>
    %cst_28 = arith.constant dense<0.000000e+00> : vector<1xf32>
    %92 = vector.multi_reduction <add>, %91, %cst_28 [1] : vector<1x512xf32> to vector<1xf32>
    %93 = vector.shape_cast %92 : vector<1xf32> to vector<1x1xf32>
    %94 = arith.divf %93, %78 : vector<1x1xf32>
    %95 = vector.broadcast %82 : vector<1x1xf32> to vector<1x512xf32>
    %96 = arith.subf %54, %95 : vector<1x512xf32>
    %97 = arith.mulf %96, %76 : vector<1x512xf32>
    %98 = vector.broadcast %86 : vector<1x1xf32> to vector<1x512xf32>
    %99 = arith.subf %5, %98 : vector<1x512xf32>
    %100 = arith.mulf %99, %76 : vector<1x512xf32>
    %101 = vector.broadcast %90 : vector<1x1xf32> to vector<1x512xf32>
    %102 = arith.subf %48, %101 : vector<1x512xf32>
    %103 = arith.mulf %102, %76 : vector<1x512xf32>
    %104 = vector.broadcast %94 : vector<1x1xf32> to vector<1x512xf32>
    %105 = arith.subf %6, %104 : vector<1x512xf32>
    %106 = arith.mulf %105, %76 : vector<1x512xf32>
    %cst_29 = arith.constant 0.000000e+00 : f32
    %107 = vector.broadcast %cst_29 : f32 to vector<5x1xf32>
    %108 = arith.mulf %97, %100 : vector<1x512xf32>
    %cst_30 = arith.constant dense<0.000000e+00> : vector<1xf32>
    %109 = vector.multi_reduction <add>, %108, %cst_30 [1] : vector<1x512xf32> to vector<1xf32>
    %110 = vector.shape_cast %109 : vector<1xf32> to vector<1x1xf32>
    %111 = arith.mulf %97, %97 : vector<1x512xf32>
    %cst_31 = arith.constant dense<0.000000e+00> : vector<1xf32>
    %112 = vector.multi_reduction <add>, %111, %cst_31 [1] : vector<1x512xf32> to vector<1xf32>
    %113 = vector.shape_cast %112 : vector<1xf32> to vector<1x1xf32>
    %114 = arith.mulf %100, %100 : vector<1x512xf32>
    %cst_32 = arith.constant dense<0.000000e+00> : vector<1xf32>
    %115 = vector.multi_reduction <add>, %114, %cst_32 [1] : vector<1x512xf32> to vector<1xf32>
    %116 = vector.shape_cast %115 : vector<1xf32> to vector<1x1xf32>
    %117 = arith.mulf %103, %106 : vector<1x512xf32>
    %cst_33 = arith.constant dense<0.000000e+00> : vector<1xf32>
    %118 = vector.multi_reduction <add>, %117, %cst_33 [1] : vector<1x512xf32> to vector<1xf32>
    %119 = vector.shape_cast %118 : vector<1xf32> to vector<1x1xf32>
    %120 = arith.mulf %103, %103 : vector<1x512xf32>
    %cst_34 = arith.constant dense<0.000000e+00> : vector<1xf32>
    %121 = vector.multi_reduction <add>, %120, %cst_34 [1] : vector<1x512xf32> to vector<1xf32>
    %122 = vector.shape_cast %121 : vector<1xf32> to vector<1x1xf32>
    %123 = arith.mulf %106, %106 : vector<1x512xf32>
    %cst_35 = arith.constant dense<0.000000e+00> : vector<1xf32>
    %124 = vector.multi_reduction <add>, %123, %cst_35 [1] : vector<1x512xf32> to vector<1xf32>
    %125 = vector.shape_cast %124 : vector<1xf32> to vector<1x1xf32>
    %126 = tpu.concatenate %78, %82, %86, %110, %113, %116, %90, %94, %119, %122, %125, %107 in 0 : vector<1x1xf32>, vector<1x1xf32>, vector<1x1xf32>, vector<1x1xf32>, vector<1x1xf32>, vector<1x1xf32>, vector<1x1xf32>, vector<1x1xf32>, vector<1x1xf32>, vector<1x1xf32>, vector<1x1xf32>, vector<5x1xf32> -> vector<16x1xf32>
    %127 = vector.shape_cast %126 : vector<16x1xf32> to vector<16x1xf32>
    %128 = vector.broadcast %127 : vector<16x1xf32> to vector<16x128xf32>
    %c0_36 = arith.constant 0 : index
    %c0_37 = arith.constant 0 : index
    %129 = vector.load %arg10[%c0_36, %c0_37] : memref<16x128xf32, #tpu.memory_space<vmem>>, vector<16x128xf32>
    tpu.vector_store %arg10[%c0_36, %c0_37], %128 {strides = array<i32>} : memref<16x128xf32, #tpu.memory_space<vmem>>, vector<16x128xf32>,
    return
  }
  func.func @transform_0(%arg0: i32) -> i32 {
    %c0_i32 = arith.constant 0 : i32
    %c0_i32_0 = arith.constant 0 : i32
    return %c0_i32 : i32
  }
  func.func @transform_1(%arg0: i32) -> (i32, i32) {
    %c0_i32 = arith.constant 0 : i32
    %c0_i32_0 = arith.constant 0 : i32
    return %c0_i32, %arg0 : i32, i32
  }
  func.func @transform_2(%arg0: i32) -> (i32, i32) {
    %c0_i32 = arith.constant 0 : i32
    %c0_i32_0 = arith.constant 0 : i32
    %c0_i32_1 = arith.constant 0 : i32
    return %c0_i32, %c0_i32_0 : i32, i32
  }
  func.func @transform_3(%arg0: i32) -> (i32, i32) {
    %c0_i32 = arith.constant 0 : i32
    %c0_i32_0 = arith.constant 0 : i32
    %c0_i32_1 = arith.constant 0 : i32
    return %c0_i32, %c0_i32_0 : i32, i32
  }
  func.func @transform_4(%arg0: i32) -> (i32, i32) {
    %c0_i32 = arith.constant 0 : i32
    %c0_i32_0 = arith.constant 0 : i32
    %c0_i32_1 = arith.constant 0 : i32
    return %c0_i32, %c0_i32_0 : i32, i32
  }
  func.func @transform_5(%arg0: i32) -> (i32, i32) {
    %c0_i32 = arith.constant 0 : i32
    %c0_i32_0 = arith.constant 0 : i32
    %c0_i32_1 = arith.constant 0 : i32
    return %c0_i32, %c0_i32_0 : i32, i32
  }
  func.func @transform_6(%arg0: i32) -> (i32, i32) {
    %c0_i32 = arith.constant 0 : i32
    %c0_i32_0 = arith.constant 0 : i32
    %c0_i32_1 = arith.constant 0 : i32
    return %c0_i32, %c0_i32_0 : i32, i32
  }
  func.func @transform_7(%arg0: i32) -> (i32, i32) {
    %c0_i32 = arith.constant 0 : i32
    %c0_i32_0 = arith.constant 0 : i32
    %c0_i32_1 = arith.constant 0 : i32
    return %c0_i32, %c0_i32_0 : i32, i32
  }
  func.func @transform_8(%arg0: i32) -> (i32, i32) {
    %c0_i32 = arith.constant 0 : i32
    %c0_i32_0 = arith.constant 0 : i32
    return %c0_i32, %arg0 : i32, i32
  }
  func.func @transform_9(%arg0: i32) -> (i32, i32) {
    %c0_i32 = arith.constant 0 : i32
    %c0_i32_0 = arith.constant 0 : i32
    return %arg0, %c0_i32 : i32, i32
  }
}

</mosaic_0001>

<bundles_post_ra>
// kernel: tpu_custom_call.1
= control target key start
LH: loop header
LB: loop body
LE: loop exit
PB: predicated region body
PF: predicated region fallthrough
CT: control target
= control target key end

     0   :  { %s2801_s0 = inlined_call_operand.vmem [shape: f32[4], index: 0, kind: input, shape index: {}]   ;;  %s2802_s1 = inlined_call_operand.vmem [shape: f32[2,1024], index: 1, kind: input, shape index: {}]   ;;  %s2803_s2 = inlined_call_operand.vmem [shape: f32[32,2], index: 2, kind: input, shape index: {}]   ;;  %s2804_s3 = inlined_call_operand.vmem [shape: f32[32,1], index: 3, kind: input, shape index: {}]   ;;  %s2805_s4 = inlined_call_operand.vmem [shape: f32[32,32], index: 4, kind: input, shape index: {}]   ;;  %s2806_s5 = inlined_call_operand.vmem [shape: f32[32,1], index: 5, kind: input, shape index: {}]   ;;  %s2807_s6 = inlined_call_operand.vmem [shape: f32[3,32], index: 6, kind: input, shape index: {}]   ;;  %s2808_s7 = inlined_call_operand.vmem [shape: f32[3,1], index: 7, kind: input, shape index: {}]   ;;  %s2809_s8 = inlined_call_operand.hbm [shape: f32[8,1024], index: 8, kind: output, shape index: {0}]   ;;  %s2810_s9 = inlined_call_operand.hbm [shape: f32[32,128], index: 9, kind: output, shape index: {1}]  }
   0x1   :  { %2820 = sst [smem:[#allocation17_spill]] %s2801_s0 }
   0x2   :  { %15 = vsyncpa [#allocation4], 0 }
   0x3   :  { %16 = vsyncpa [#allocation3], 0 }
   0x4   :  { %18 = vsyncpa [#allocation3 + $0x1], 0 }
   0x5   :  { %19 = vsyncpa [#allocation7], 0 }
   0x6   :  { %21 = vsyncpa [#allocation7 + $0x1], 0  ;;  %s2093_s30 = smov 0   ;;  %s2095_s10 = smov 0  }
   0x7   :  { %s2097_s11 = smov 0   ;;  %s2099_s12 = smov 0  }
   0x8 LB: > { %s2114_s13 = sadd.s32 4294967295, %s2031_s12   ;;  %s1796_s14 = sadd.s32 4294967294, %s2031_s12   ;;  %s2031_s12 = sphi %s2099_s12, %s2842_s12   ;;  %s2027_s11 = sphi %s2097_s11, %s2841_s11   ;;  %s2023_s10 = sphi %s2095_s10, %s2840_s10   ;;  %s2019_s30 = sphi %s2093_s30, %s2839_s30  }
   0x9   : > { %s2118_s15 = sadd.s32 1, %s2031_s12   ;;  %s207_s16 = sadd.s32 1, %s2027_s11 }
   0xa   : > { %s204_s17 = ssub.s32 %s2031_s12, %s2118_s15  ;;  %p217_p0 = scmp.ne.s32.totalorder %s2027_s11, %s2023_s10 }
   0xb   : > { %p205_p1 = scmp.eq.s32.totalorder %s204_s17, 0  ;;  %p218_p2 = scmp.eq.s32.totalorder %s2114_s13, 1 }
   0xc   : > { %p223_p3 = scmp.ne.s32.totalorder %s2023_s10, %s2019_s30  ;;  %p224_p4 = scmp.eq.s32.totalorder %s1796_s14, 1 }
   0xd   : > { %s2129_s18 = scalar_select %p205_p1, %s2027_s11, %s207_s16  }
   0xe   : > { %p2131_p5 = por %p218_p2, %p217_p0  ;;  %p2135_p6 = por %p224_p4, %p223_p3 }
   0xf   : > { %p1797_p7 = scmp.ge.s32.totalorder %s2031_s12, 1  ;;  %p257_p8 = scmp.lt.s32.totalorder %s2031_s12, 3 }
  0x10   : > { %p1853_p9 = scmp.eq.s32.totalorder %s2114_s13, 0  ;;  %s2824_s0 = sld [smem:[#allocation17_spill]] }
  0x11   : > { %p2142_p10 = pnand %p1797_p7, %p257_p8 }
  0x13   : > { %p1842_p11 = pneg %p2142_p10 }
  0x15   : > { %p1843_p12 = pnand %p1853_p9, %p1842_p11 }
  0x16   : > { %s270_s24 = sshll.u32 %s2824_s0, 4  ;;  %s271_s24 = int_to_ptr.vmem [resolvable:$true] %s270_s24 }
  0x17   : > { %s1922_s25 = scalar_lea.vmem %s271_s24, 16  ;;  %p1924_p0 = pneg %p1843_p12 }
  0x18   : > { %p1923_p13 = scmp.ne.s32.totalorder %s271_s24, %s1922_s25  ;;  %p1930_p3 = scmp.lt.s32.totalorder %s271_s24, %s271_s24 }
  0x19   : > { %p1931_p4 = scmp.lt.s32.totalorder %s1922_s25, %s1922_s25 }
  0x1a   : > { %p1925_p1 = pnand %p1924_p0, %p1923_p13 }
  0x1b   : > { %p1932_p7 = por %p1931_p4, %p1930_p3 }
  0x1c   : > { %p1926_p2 = pneg %p1925_p1 }
  0x1e   : > { %p1933_p8 = pnand %p1932_p7, %p1926_p2 }
  0x20   : > { %1936 = shalt.err (!%p1933_p8)
}
  0x21   : > { %s2033_s26 = smov [#allocation2]   ;;  %310 = sbr.rel (%p2142_p10) target bundleno = 1117 (0x45d), region = 52 }
  0x22   : > { %1845 = dma.vmem_to_smem (!%p1843_p12), %s271_s24, 16, %s2033_s26, [#allocation4]  }
  0x26   : > { %2006 = dma.done.wait (%p1853_p9), [#allocation4], 16  }
  0x27   : > { %2008 = vsyncadd (%p1853_p9), [#allocation4], 4294967280 }
  0x28   : > { %316 = sfence }
  0x29   : > { %v368_v0 = vld [vmem:[%s2803_s2 + $0x18] sm:$0xff]  ;;  %v367_v1 = vld [vmem:[%s2803_s2 + $0x10] sm:$0xff]  ;;  %v2034_v2 = vmov 1   ;;  %v2035_v3 = vmov 0   ;;  %v366_v4 = vld [vmem:[%s2803_s2 + $0x8] sm:$0xff]  ;;  %v2812_v14 = vmov 0.0   ;;  %v2811_v16 = vlaneseq }
  0x2a   : > { %1896 = vset.pattern.permute.xlu0 %v2034_v2  ;;  %1897 = vset.pattern.permute.xlu1 %v2035_v3  ;;  %v365_v5 = vld [vmem:[%s2803_s2] sm:$0xff]  ;;  %v529_v6 = vld [vmem:[%s2804_s3 + $0x18] sm:$0xff]  ;;  %v527_v7 = vld [vmem:[%s2804_s3 + $0x8] sm:$0xff]  ;;  %s1804_s29 = sshll.u32 %s2114_s13, 2  ;;  %s1819_s17 = sshll.u32 %s2114_s13, 9 }
  0x2b   : > { %455 = vperm.xlu0 %1896, %v368_v0   ;;  %381 = vperm.xlu1 %1897, %v367_v1   ;;  %v621_v8 = vld [vmem:[%s2806_s5 + $0x18] sm:$0xff]  ;;  %v528_v9 = vld [vmem:[%s2804_s3 + $0x10] sm:$0xff]  ;;  %v619_v10 = vld [vmem:[%s2806_s5 + $0x8] sm:$0xff]  ;;  %p353_p9 = scmp.lt.s32.totalorder %s1804_s29, 7  ;;  %v2202_v17 = vshrl.u32 %v2811_v16, 7  ;;  %s360_s22 = sld [smem:[#allocation2]] }
  0x2c   : > { %v526_v11 = vld [vmem:[%s2804_s3] sm:$0xff]  ;;  %v620_v13 = vld [vmem:[%s2806_s5 + $0x10] sm:$0xff]  ;;  %719 = vmatprep.mubr.f32.mxu0 %v2812_v14  ;;  %808 = vmatprep.mubr.f32.mxu1 %v2812_v14  ;;  %s1806_s23 = sld [smem:[#allocation2 + $0x1]]  ;;  %s2582_s26 = sand.u32 1, %s2023_s10  }
  0x2d   : > { %v882_v12 = vld [vmem:[%s2808_s7] sm:$0x7]  ;;  %s2844_s29 = smov (!%p353_p9, %s1804_s29), 7  ;;  %v2210_v18 = vsub.s32 0, %v2202_v17  ;;  %v2213_v19 = vsub.s32 2, %v2202_v17  ;;  %v2216_v20 = vsub.s32 4, %v2202_v17 }
  0x2e   : > { %v618_v15 = vld [vmem:[%s2806_s5] sm:$0xff]  ;;  %s1805_s14 = sshll.u32 %s2844_s29, 1  ;;  %v2219_v21 = vsub.s32 6, %v2202_v17  ;;  %v2225_v23 = vsub.s32 1, %v2202_v17  ;;  %v2228_v24 = vsub.s32 3, %v2202_v17  ;;  %v2231_v25 = vsub.s32 5, %v2202_v17 }
  0x2f   : > { %1898 = vset.pattern.permute.xlu1 %v2034_v2  ;;  %447 = vperm.xlu0 %1896, %v366_v4   ;;  %s2207_s21 = scalar_lea.vmem %s2802_s1, %s1805_s14  ;;  %v2246_v29 = vsub.s32 7, %v2202_v17  ;;  %s1807_s24 = sld [smem:[#allocation2 + $0x2]] }
  0x30   : > { %451 = vperm.xlu1 %1898, %v367_v1   ;;  %v2222_v22 = vld [vmem:[%s2207_s21] sm:$0xff]  ;;  %s2508_s25 = sld [smem:[#allocation2 + $0x3]]  ;;  %s1802_s27 = sshll.u32 %s2582_s26, 5 }
  0x31   : > { %v2235_v26 = vrot.slane %v2222_v22, %v2210_v18  ;;  %v2239_v27 = vrot.slane %v2222_v22, %v2213_v19  ;;  %v2243_v28 = vrot.slane %v2222_v22, %v2216_v20  ;;  %v2250_v30 = vrot.slane %v2222_v22, %v2219_v21  ;;  %s2621_s28 = scalar_lea.vmem [#allocation5], %s1802_s27  ;;  %s2729_s14 = scalar_lea.hbm %s2809_s8, %s1819_s17 }
  0x32   : > { %v2254_v33 = vrot.slane %v2222_v22, %v2225_v23  ;;  %v2258_v34 = vrot.slane %v2222_v22, %v2228_v24  ;;  %v2262_v35 = vrot.slane %v2222_v22, %v2231_v25  ;;  %v2272_v39 = vrot.slane %v2222_v22, %v2246_v29  ;;  %s1677_s16 = sshll.u32 %s2621_s28, 4  ;;  %s1678_s16 = int_to_ptr.vmem [resolvable:$true] %s1677_s16 }
  0x33   : > { %1900 = vset.pattern.permute.xlu0 %v2035_v3  ;;  %2825 = vst [vmem:[#allocation11_spill] sm:$0xff] %v2235_v26  ;;  %2826 = vst [vmem:[#allocation12_spill] sm:$0xff] %v2250_v30  ;;  %v413_v36 = vrot.slane %v2235_v26, %v2210_v18  ;;  %v417_v37 = vrot.slane %v2239_v27, %v2210_v18  ;;  %v421_v38 = vrot.slane %v2243_v28, %v2210_v18 }
  0x34   : > { %1899 = vset.pattern.permute.xlu1 %v2035_v3  ;;  %386 = vperm.xlu0 %1900, %v368_v0   ;;  %2827 = vst [vmem:[#allocation13_spill] sm:$0xff] %v2254_v33  ;;  %2828 = vst [vmem:[#allocation14_spill] sm:$0xff] %v2258_v34  ;;  %v425_v40 = vrot.slane %v2250_v30, %v2210_v18  ;;  %v2278_v42 = vrot.slane %v2254_v33, %v2225_v23 }
  0x35   : > { %376 = vperm.xlu1 %1899, %v366_v4   ;;  %2829 = vst [vmem:[#allocation15_spill] sm:$0xff] %v2262_v35  ;;  %2830 = vst [vmem:[#allocation16_spill] sm:$0xff] %v2272_v39  ;;  %v2282_v43 = vrot.slane %v2258_v34, %v2225_v23  ;;  %v2286_v44 = vrot.slane %v2262_v35, %v2225_v23  ;;  %v493_v49 = vrot.slane %v2272_v39, %v2225_v23 }
  0x38   : > { %371 = vperm.xlu0 %1900, %v365_v5  }
  0x39   : > { %547 = vperm.xlu1 %1899, %v529_v6  }
  0x3c   : > { %537 = vperm.xlu0 %1900, %v527_v7  }
  0x3d   : > { %1901 = vset.pattern.permute.xlu1 %v2034_v2 }
  0x3e   : > { %443 = vperm.xlu1 %1901, %v365_v5  }
  0x40   : > { %639 = vperm.xlu0 %1900, %v621_v8  }
  0x42   : > { %1902 = vset.pattern.permute.xlu1 %v2035_v3 }
  0x43   : > { %542 = vperm.xlu1 %1902, %v528_v9  }
  0x44   : > { %629 = vperm.xlu0 %1900, %v619_v10  }
  0x47   : > { %532 = vperm.xlu1 %1902, %v526_v11  }
  0x48   : > { %885 = vperm.xlu0 %1900, %v882_v12  }
  0x4b   : > { %634 = vperm.xlu1 %1902, %v620_v13  }
  0x4f   : > { %624 = vperm.xlu1 %1902, %v618_v15  }
  0xa6   : > { %v382_v31 = vpop.permute.xlu1 %381  ;;  %v456_v32 = vpop.permute.xlu0 %455 }
  0xa7   : > { %v434_v46 = vmul.f32 %v413_v36, %v382_v31  ;;  %v435_v47 = vmul.f32 %v417_v37, %v382_v31  ;;  %v436_v48 = vmul.f32 %v421_v38, %v382_v31  ;;  %v2290_v50 = vmul.f32 %v425_v40, %v382_v31 }
  0xa8   : > { %v506_v51 = vmul.f32 %v2278_v42, %v456_v32  ;;  %v507_v52 = vmul.f32 %v2282_v43, %v456_v32  ;;  %v508_v53 = vmul.f32 %v2286_v44, %v456_v32  ;;  %v509_v54 = vmul.f32 %v493_v49, %v456_v32 }
  0xaa   : > { %v448_v41 = vpop.permute.xlu0 %447 }
  0xab   : > { %v452_v45 = vpop.permute.xlu1 %451  ;;  %v498_v55 = vmul.f32 %v2278_v42, %v448_v41  ;;  %v499_v56 = vmul.f32 %v2282_v43, %v448_v41  ;;  %v500_v57 = vmul.f32 %v2286_v44, %v448_v41  ;;  %v501_v61 = vmul.f32 %v493_v49, %v448_v41 }
  0xac   : > { %v502_v58 = vmul.f32 %v2278_v42, %v452_v45  ;;  %v503_v59 = vmul.f32 %v2282_v43, %v452_v45  ;;  %v504_v60 = vmul.f32 %v2286_v44, %v452_v45  ;;  %v505_v12 = vmul.f32 %v493_v49, %v452_v45 }
  0xae   : > { %v518_v15 = vadd.f32 %v502_v58, %v434_v46  ;;  %v519_v31 = vadd.f32 %v503_v59, %v435_v47  ;;  %v520_v32 = vadd.f32 %v504_v60, %v436_v48 }
  0xaf   : > { %v387_v62 = vpop.permute.xlu0 %386 }
  0xb0   : > { %v438_v63 = vmul.f32 %v413_v36, %v387_v62  ;;  %v439_v0 = vmul.f32 %v417_v37, %v387_v62  ;;  %v440_v1 = vmul.f32 %v421_v38, %v387_v62  ;;  %v441_v2 = vmul.f32 %v425_v40, %v387_v62  ;;  %v377_v3 = vpop.permute.xlu1 %376 }
  0xb1   : > { %v430_v4 = vmul.f32 %v413_v36, %v377_v3  ;;  %v431_v5 = vmul.f32 %v417_v37, %v377_v3  ;;  %v432_v6 = vmul.f32 %v421_v38, %v377_v3  ;;  %v433_v7 = vmul.f32 %v425_v40, %v377_v3 }
  0xb2   : > { %v523_v8 = vadd.f32 %v507_v52, %v439_v0  ;;  %v525_v9 = vadd.f32 %v509_v54, %v441_v2  ;;  %v522_v10 = vadd.f32 %v506_v51, %v438_v63  ;;  %v524_v11 = vadd.f32 %v508_v53, %v440_v1 }
  0xb3   : > { %v372_v13 = vpop.permute.xlu0 %371  ;;  %v514_v16 = vadd.f32 %v498_v55, %v430_v4  ;;  %v515_v14 = vadd.f32 %v499_v56, %v431_v5  ;;  %v516_v39 = vadd.f32 %v500_v57, %v432_v6  ;;  %v517_v34 = vadd.f32 %v501_v61, %v433_v7 }
  0xb4   : > { %v548_v41 = vpop.permute.xlu1 %547  ;;  %v426_v62 = vmul.f32 %v413_v36, %v372_v13  ;;  %v427_v30 = vmul.f32 %v417_v37, %v372_v13  ;;  %v428_v3 = vmul.f32 %v421_v38, %v372_v13  ;;  %v429_v52 = vmul.f32 %v425_v40, %v372_v13 }
  0xb5   : > { %v563_v35 = vadd.f32 %v548_v41, %v523_v8  ;;  %v565_v33 = vadd.f32 %v548_v41, %v525_v9  ;;  %v562_v26 = vadd.f32 %v548_v41, %v522_v10  ;;  %v564_v54 = vadd.f32 %v548_v41, %v524_v11 }
  0xb7   : > { %v538_v51 = vpop.permute.xlu0 %537  ;;  %vm579_vm0 = vcmp.ge.f32.partialorder %v563_v35, 0.0  ;;  %v595_v45 = vmul.f32 0.01, %v563_v35  ;;  %vm581_vm1 = vcmp.ge.f32.partialorder %v565_v33, 0.0  ;;  %v597_v46 = vmul.f32 0.01, %v565_v33 }
  0xb8   : > { %v554_v47 = vadd.f32 %v538_v51, %v514_v16  ;;  %v555_v48 = vadd.f32 %v538_v51, %v515_v14  ;;  %v2301_v53 = vadd.f32 %v538_v51, %v516_v39  ;;  %v557_v55 = vadd.f32 %v538_v51, %v517_v34 }
  0xb9   : > { %v444_v56 = vpop.permute.xlu1 %443  ;;  %v611_v57 = vsel %vm579_vm0, %v563_v35, %v595_v45  ;;  %v613_v36 = vsel %vm581_vm1, %v565_v33, %v597_v46  ;;  %vm578_vm2 = vcmp.ge.f32.partialorder %v562_v26, 0.0  ;;  %v594_v58 = vmul.f32 0.01, %v562_v26 }
  0xba   : > { %v494_v37 = vmul.f32 %v2278_v42, %v444_v56  ;;  %v495_v38 = vmul.f32 %v2282_v43, %v444_v56  ;;  %v496_v40 = vmul.f32 %v2286_v44, %v444_v56  ;;  %v497_v59 = vmul.f32 %v493_v49, %v444_v56  ;;  %679 = vmatprep.subr.mxu0 %v611_v57  ;;  %v615_v56 = vld [vmem:[%s2805_s4 + $0x8] sm:$0xff]  ;;  %v616_v57 = vld [vmem:[%s2805_s4 + $0x10] sm:$0xff] }
  0xbb   : > { %768 = vmatprep.subr.mxu1 %v613_v36  ;;  %v610_v60 = vsel %vm578_vm2, %v562_v26, %v594_v58  ;;  %vm580_vm3 = vcmp.ge.f32.partialorder %v564_v54, 0.0  ;;  %v596_v14 = vmul.f32 0.01, %v564_v54  ;;  %v521_v16 = vadd.f32 %v505_v12, %v2290_v50  ;;  %v617_v36 = vld [vmem:[%s2805_s4 + $0x18] sm:$0xff] }
  0xbc   : > { %680 = vmatpush1.msra.mxu0 %v610_v60  ;;  %v510_v34 = vadd.f32 %v494_v37, %v426_v62  ;;  %v511_v35 = vadd.f32 %v495_v38, %v427_v30  ;;  %v512_v33 = vadd.f32 %v496_v40, %v428_v3  ;;  %vm571_vm4 = vcmp.ge.f32.partialorder %v555_v48, 0.0  ;;  %v640_v60 = vpop.permute.xlu0 %639 }
  0xbd   : > { %v612_v39 = vsel %vm580_vm3, %v564_v54, %v596_v14  ;;  %v587_v61 = vmul.f32 0.01, %v555_v48  ;;  %vm573_vm5 = vcmp.ge.f32.partialorder %v557_v55, 0.0  ;;  %v589_v42 = vmul.f32 0.01, %v557_v55 }
  0xbe   : > { %769 = vmatpush1.msra.mxu1 %v612_v39  ;;  %v543_v43 = vpop.permute.xlu1 %542  ;;  %v513_v44 = vadd.f32 %v497_v59, %v429_v52  ;;  %vm570_vm6 = vcmp.ge.f32.partialorder %v554_v47, 0.0  ;;  %v586_v49 = vmul.f32 0.01, %v554_v47  ;;  %vm572_vm7 = vcmp.ge.f32.partialorder %v2301_v53, 0.0 }
  0xbf   : > { %v558_v26 = vadd.f32 %v543_v43, %v518_v15  ;;  %v559_v63 = vadd.f32 %v543_v43, %v519_v31  ;;  %v560_v0 = vadd.f32 %v543_v43, %v520_v32  ;;  %v561_v50 = vadd.f32 %v543_v43, %v521_v16 }
  0xc0   : > { %v603_v1 = vsel %vm571_vm4, %v555_v48, %v587_v61  ;;  %v605_v2 = vsel %vm573_vm5, %v557_v55, %v589_v42  ;;  %v602_v30 = vsel %vm570_vm6, %v554_v47, %v586_v49  ;;  %v588_v4 = vmul.f32 0.01, %v2301_v53  ;;  %v614_v55 = vld [vmem:[%s2805_s4] sm:$0xff]  ;;  %v630_v43 = vpop.permute.xlu0 %629 }
  0xc1   : > { %vm575_vm8 = vcmp.ge.f32.partialorder %v559_v63, 0.0  ;;  %v591_v5 = vmul.f32 0.01, %v559_v63  ;;  %vm577_vm9 = vcmp.ge.f32.partialorder %v561_v50, 0.0  ;;  %v593_v6 = vmul.f32 0.01, %v561_v50 }
  0xc2   : > { %v533_v7 = vpop.permute.xlu1 %532  ;;  %vm574_vm10 = vcmp.ge.f32.partialorder %v558_v26, 0.0  ;;  %v590_v8 = vmul.f32 0.01, %v558_v26  ;;  %vm576_vm11 = vcmp.ge.f32.partialorder %v560_v0, 0.0  ;;  %v592_v9 = vmul.f32 0.01, %v560_v0 }
  0xc3   : > { %v550_v10 = vadd.f32 %v533_v7, %v510_v34  ;;  %v551_v11 = vadd.f32 %v533_v7, %v511_v35  ;;  %v552_v12 = vadd.f32 %v533_v7, %v512_v33  ;;  %v553_v13 = vadd.f32 %v533_v7, %v513_v44 }
  0xc4   : > { %v607_v15 = vsel %vm575_vm8, %v559_v63, %v591_v5  ;;  %v609_v31 = vsel %vm577_vm9, %v561_v50, %v593_v6  ;;  %v606_v32 = vsel %vm574_vm10, %v558_v26, %v590_v8  ;;  %v608_v41 = vsel %vm576_vm11, %v560_v0, %v592_v9 }
  0xc5   : > { %681 = vmatprep.subr.mxu0 %v607_v15  ;;  %770 = vmatprep.subr.mxu1 %v609_v31  ;;  %vm567_vm12 = vcmp.ge.f32.partialorder %v551_v11, 0.0  ;;  %v583_v62 = vmul.f32 0.01, %v551_v11  ;;  %vm569_vm13 = vcmp.ge.f32.partialorder %v553_v13, 0.0  ;;  %v585_v3 = vmul.f32 0.01, %v553_v13 }
  0xc6   : > { %682 = vmatpush1.msra.mxu0 %v606_v32  ;;  %771 = vmatpush1.msra.mxu1 %v608_v41  ;;  %vm566_vm14 = vcmp.ge.f32.partialorder %v550_v10, 0.0  ;;  %v582_v52 = vmul.f32 0.01, %v550_v10  ;;  %vm568_vm15 = vcmp.ge.f32.partialorder %v552_v12, 0.0  ;;  %v584_v54 = vmul.f32 0.01, %v552_v12  ;;  %v635_v38 = vpop.permute.xlu1 %634 }
  0xc7   : > { %683 = vmatprep.subr.mxu0 %v603_v1  ;;  %772 = vmatprep.subr.mxu1 %v605_v2  ;;  %v604_v51 = vsel %vm572_vm7, %v2301_v53, %v588_v4  ;;  %v599_v45 = vsel %vm567_vm12, %v551_v11, %v583_v62  ;;  %v601_v46 = vsel %vm569_vm13, %v553_v13, %v585_v3  ;;  %vm642_vm0 = vcmask 261120  }
  0xc8   : > { %684 = vmatpush1.msra.mxu0 %v602_v30  ;;  %773 = vmatpush1.msra.mxu1 %v604_v51  ;;  %v598_v47 = vsel %vm566_vm14, %v550_v10, %v582_v52  ;;  %v600_v48 = vsel %vm568_vm15, %v552_v12, %v584_v54  ;;  %v2831_v53 = vmov 0.0  }
  0xc9   : > { %685 = vmatprep.subr.mxu0 %v599_v45  ;;  %774 = vmatprep.subr.mxu1 %v601_v46 }
  0xca   : > { %686 = vmatpush1.msra.mxu0 %v598_v47  ;;  %775 = vmatpush1.msra.mxu1 %v600_v48  ;;  %v625_v33 = vpop.permute.xlu1 %624 }
  0xcb   : > { %1809 = vmatmul.mubr.msk.f32.vlgmr.msra.gmra.mxu0 %vm642_vm0, %v614_v55  ;;  %1813 = vmatmul.mubr.msk.f32.vlgmr.msra.gmra.mxu1 %vm642_vm0, %v614_v55 }
  0xcc   : > { %725 = vmatprep.mubr.f32.mxu0 %v2831_v53  ;;  %814 = vmatprep.mubr.f32.mxu1 %v2831_v53 }
  0xcf   : > { %1810 = vmatmul.mubr.msk.f32.gmra.mxu0 %vm642_vm0, %v615_v56  ;;  %1814 = vmatmul.mubr.msk.f32.gmra.mxu1 %vm642_vm0, %v615_v56 }
  0xd0   : > { %731 = vmatprep.mubr.f32.mxu0 %v2831_v53  ;;  %820 = vmatprep.mubr.f32.mxu1 %v2831_v53 }
  0xd3   : > { %1811 = vmatmul.mubr.msk.f32.gmra.mxu0 %vm642_vm0, %v616_v57  ;;  %1815 = vmatmul.mubr.msk.f32.gmra.mxu1 %vm642_vm0, %v616_v57 }
  0xd4   : > { %737 = vmatprep.mubr.f32.mxu0 %v2831_v53  ;;  %826 = vmatprep.mubr.f32.mxu1 %v2831_v53 }
  0xd7   : > { %1812 = vmatmul.mubr.msk.f32.gmra.mxu0 %vm642_vm0, %v617_v36  ;;  %1816 = vmatmul.mubr.msk.f32.gmra.mxu1 %vm642_vm0, %v617_v36 }
  0xd8   : > { %955 = vmatprep.mubr.f32.mxu0 %v2831_v53  ;;  %1026 = vmatprep.mubr.f32.mxu1 %v2831_v53 }
 0x18b   : > { %v721_v58 = vpop.f32.mrf.mxu0  ;;  %v810_v37 = vpop.f32.mrf.mxu1 }
 0x18c   : > { %v2340_v39 = vadd.f32 %v721_v58, %v625_v33  ;;  %v2342_v44 = vadd.f32 %v810_v37, %v625_v33 }
 0x18d   : > { %v723_v40 = vpop.f32.mrf.mxu0  ;;  %v812_v59 = vpop.f32.mrf.mxu1 }
 0x18e   : > { %v2344_v49 = vadd.f32 %v723_v40, %v625_v33  ;;  %v2346_v26 = vadd.f32 %v812_v59, %v625_v33  ;;  %v2357_v4 = vmul.f32 0.01, %v2340_v39  ;;  %v2360_v9 = vmul.f32 0.01, %v2342_v44 }
 0x18f   : > { %v727_v14 = vpop.f32.mrf.mxu0  ;;  %v816_v16 = vpop.f32.mrf.mxu1  ;;  %vm833_vm15 = vcmp.ge.f32.partialorder %v2340_v39, 0.0 }
 0x190   : > { %v2348_v63 = vadd.f32 %v727_v14, %v630_v43  ;;  %v2350_v0 = vadd.f32 %v816_v16, %v630_v43  ;;  %v2363_v10 = vmul.f32 0.01, %v2344_v49  ;;  %v852_v13 = vmul.f32 0.01, %v2346_v26 }
 0x191   : > { %v729_v34 = vpop.f32.mrf.mxu0  ;;  %v818_v35 = vpop.f32.mrf.mxu1  ;;  %vm834_vm13 = vcmp.ge.f32.partialorder %v2344_v49, 0.0  ;;  %vm836_vm14 = vcmp.ge.f32.partialorder %v2346_v26, 0.0 }
 0x192   : > { %v2352_v2 = vadd.f32 %v729_v34, %v630_v43  ;;  %v2354_v30 = vadd.f32 %v818_v35, %v630_v43  ;;  %v853_v15 = vmul.f32 0.01, %v2348_v63  ;;  %v855_v31 = vmul.f32 0.01, %v2350_v0 }
 0x193   : > { %v733_v61 = vpop.f32.mrf.mxu0  ;;  %v822_v42 = vpop.f32.mrf.mxu1  ;;  %vm837_vm11 = vcmp.ge.f32.partialorder %v2348_v63, 0.0  ;;  %vm839_vm12 = vcmp.ge.f32.partialorder %v2350_v0, 0.0  ;;  %v866_v43 = vsel %vm834_vm13, %v2344_v49, %v2363_v10  ;;  %v2832_v49 = vlaneseq }
 0x194   : > { %v854_v62 = vmul.f32 0.01, %v2352_v2  ;;  %v856_v3 = vmul.f32 0.01, %v2354_v30  ;;  %v734_v52 = vadd.f32 %v733_v61, %v635_v38  ;;  %v823_v54 = vadd.f32 %v822_v42, %v635_v38 }
 0x195   : > { %v735_v50 = vpop.f32.mrf.mxu0  ;;  %v824_v1 = vpop.f32.mrf.mxu1  ;;  %vm838_vm9 = vcmp.ge.f32.partialorder %v2352_v2, 0.0  ;;  %vm840_vm10 = vcmp.ge.f32.partialorder %v2354_v30, 0.0  ;;  %v869_v61 = vsel %vm837_vm11, %v2348_v63, %v853_v15  ;;  %v871_v42 = vsel %vm839_vm12, %v2350_v0, %v855_v31 }
 0x196   : > { %v736_v5 = vadd.f32 %v735_v50, %v635_v38  ;;  %v825_v6 = vadd.f32 %v824_v1, %v635_v38  ;;  %v857_v36 = vmul.f32 0.01, %v734_v52  ;;  %v859_v58 = vmul.f32 0.01, %v823_v54  ;;  %v881_v1 = vld [vmem:[%s2807_s6] sm:$0x7] }
 0x197   : > { %v739_v7 = vpop.f32.mrf.mxu0  ;;  %v828_v8 = vpop.f32.mrf.mxu1  ;;  %vm841_vm7 = vcmp.ge.f32.partialorder %v734_v52, 0.0  ;;  %vm843_vm8 = vcmp.ge.f32.partialorder %v823_v54, 0.0  ;;  %v870_v35 = vsel %vm838_vm9, %v2352_v2, %v854_v62  ;;  %v872_v33 = vsel %vm840_vm10, %v2354_v30, %v856_v3 }
 0x198   : > { %v740_v11 = vadd.f32 %v739_v7, %v640_v60  ;;  %v829_v12 = vadd.f32 %v828_v8, %v640_v60  ;;  %v858_v51 = vmul.f32 0.01, %v736_v5  ;;  %v860_v45 = vmul.f32 0.01, %v825_v6 }
 0x199   : > { %v741_v32 = vpop.f32.mrf.mxu0  ;;  %v830_v41 = vpop.f32.mrf.mxu1  ;;  %vm842_vm5 = vcmp.ge.f32.partialorder %v736_v5, 0.0  ;;  %vm844_vm6 = vcmp.ge.f32.partialorder %v825_v6, 0.0  ;;  %v873_v16 = vsel %vm841_vm7, %v734_v52, %v857_v36  ;;  %v875_v34 = vsel %vm843_vm8, %v823_v54, %v859_v58 }
 0x19a   : > { %v742_v46 = vadd.f32 %v741_v32, %v640_v60  ;;  %v831_v47 = vadd.f32 %v830_v41, %v640_v60  ;;  %vm845_vm1 = vcmp.ge.f32.partialorder %v740_v11, 0.0  ;;  %v861_v48 = vmul.f32 0.01, %v740_v11 }
 0x19b   : > { %vm847_vm2 = vcmp.ge.f32.partialorder %v829_v12, 0.0  ;;  %v863_v55 = vmul.f32 0.01, %v829_v12  ;;  %v874_v60 = vsel %vm842_vm5, %v736_v5, %v858_v51  ;;  %v876_v14 = vsel %vm844_vm6, %v825_v6, %v860_v45 }
 0x19c   : > { %v862_v56 = vmul.f32 0.01, %v742_v46  ;;  %v864_v57 = vmul.f32 0.01, %v831_v47  ;;  %vm846_vm3 = vcmp.ge.f32.partialorder %v742_v46, 0.0  ;;  %vm848_vm4 = vcmp.ge.f32.partialorder %v831_v47, 0.0 }
 0x19d   : > { %v877_v40 = vsel %vm845_vm1, %v740_v11, %v861_v48  ;;  %v879_v59 = vsel %vm847_vm2, %v829_v12, %v863_v55  ;;  %vm835_vm1 = vcmp.ge.f32.partialorder %v2342_v44, 0.0  ;;  %v868_v50 = vsel %vm836_vm14, %v2346_v26, %v852_v13 }
 0x19e   : > { %v878_v37 = vsel %vm846_vm3, %v742_v46, %v862_v56  ;;  %v880_v38 = vsel %vm848_vm4, %v831_v47, %v864_v57  ;;  %v865_v63 = vsel %vm833_vm15, %v2340_v39, %v2357_v4  ;;  %v867_v0 = vsel %vm835_vm1, %v2342_v44, %v2360_v9 }
 0x19f   : > { %915 = vmatprep.subr.mxu0 %v878_v37  ;;  %986 = vmatprep.subr.mxu1 %v880_v38  ;;  %v1270_v26 = vand.u32 127, %v2832_v49  ;;  %v1275_v6 = vstv %s1819_s17  ;;  %v2037_v10 = vmov 1983009808   ;;  %vm1405_vm6 = vcmask 1041409  }
 0x1a0   : > { %916 = vmatpush1.msra.mxu0 %v877_v40  ;;  %987 = vmatpush1.msra.mxu1 %v879_v59  ;;  %v1100_v44 = vunpack.c.l.s4 %v2037_v10  ;;  %vm1301_vm7 = vcmask 1042434   ;;  %vm1235_vm8 = vcmask 1041408   ;;  %vm1240_vm9 = vcmask 1042432  }
 0x1a1   : > { %917 = vmatprep.subr.mxu0 %v874_v60  ;;  %988 = vmatprep.subr.mxu1 %v876_v14  ;;  %v1271_v2 = vadd.s32 128, %v1270_v26  ;;  %v1272_v30 = vadd.s32 256, %v1270_v26  ;;  %v1273_v5 = vadd.s32 384, %v1270_v26  ;;  %v1276_v39 = vadd.s32 %v1275_v6, %v1270_v26 }
 0x1a2   : > { %918 = vmatpush1.msra.mxu0 %v873_v16  ;;  %989 = vmatpush1.msra.mxu1 %v875_v34  ;;  %v1101_v31 = vunpack.c.0.s8 %v1100_v44  ;;  %vm1245_vm10 = vcmask 1043456   ;;  %vm1250_vm11 = vcmask 1044480   ;;  %vm1255_vm12 = vcmask 1045504  }
 0x1a3   : > { %919 = vmatprep.subr.mxu0 %v870_v35  ;;  %990 = vmatprep.subr.mxu1 %v872_v33  ;;  %v1277_v4 = vadd.s32 %v1275_v6, %v1271_v2  ;;  %v1278_v7 = vadd.s32 %v1275_v6, %v1272_v30  ;;  %v1279_v8 = vadd.s32 %v1275_v6, %v1273_v5  ;;  %vm1280_vm2 = vcmp.lt.s32.totalorder %v1276_v39, 1000 }
 0x1a4   : > { %920 = vmatpush1.msra.mxu0 %v869_v61  ;;  %991 = vmatpush1.msra.mxu1 %v871_v42  ;;  %v2417_v9 = vsel %vm1280_vm2, 1.0, %v2831_v53  ;;  %v2435_v62 = vsub.s32 %v1101_v31, %v2202_v17  ;;  %vm1260_vm13 = vcmask 1046528  }
 0x1a5   : > { %921 = vmatprep.subr.mxu0 %v866_v43  ;;  %992 = vmatprep.subr.mxu1 %v868_v50  ;;  %vm1281_vm3 = vcmp.lt.s32.totalorder %v1277_v4, 1000  ;;  %vm1282_vm4 = vcmp.lt.s32.totalorder %v1278_v7, 1000  ;;  %vm1283_vm5 = vcmp.lt.s32.totalorder %v1279_v8, 1000 }
 0x1a6   : > { %922 = vmatpush1.msra.mxu0 %v865_v63  ;;  %993 = vmatpush1.msra.mxu1 %v867_v0  ;;  %v2420_v11 = vsel %vm1281_vm3, 1.0, %v2831_v53  ;;  %v2423_v12 = vsel %vm1282_vm4, 1.0, %v2831_v53  ;;  %v2426_v13 = vsel %vm1283_vm5, 1.0, %v2831_v53  ;;  %v886_v0 = vpop.permute.xlu0 %885 }
 0x1a7   : > { %1817 = vmatmul.mubr.msk.f32.vlgmr.msra.gmra.mxu0 %vm642_vm0, %v881_v1  ;;  %1818 = vmatmul.mubr.msk.f32.vlgmr.msra.gmra.mxu1 %vm642_vm0, %v881_v1  ;;  %v1318_v15 = vcombine.low %v2423_v12, %v2426_v13  ;;  %v1317_v32 = vcombine.low %v2417_v9, %v2420_v11  ;;  %v1292_v41 = vadd.f32 %v2420_v11, %v2417_v9  ;;  %vm1230_vm0 = vcmask 1040384  }
 0x1a9   : > { %v1293_v3 = vadd.f32 %v2423_v12, %v1292_v41  ;;  %v1325_v52 = vrot.slane %v1317_v32, %v2435_v62  ;;  %v1332_v53 = vrot.slane %v1318_v15, %v2435_v62 }
 0x1ab   : > { %v1294_v54 = vadd.f32 %v2426_v13, %v1293_v3  ;;  %v2441_v51 = vcombine.low %v1325_v52, %v1332_v53 }
 0x1ad   : > { %1295 = vadd.xlane.f32.xlu1 %v1294_v54  ;;  %v1335_v45 = vmul.f32 %v2441_v51, %v2222_v22  ;;  %v1381_v46 = vrot.slane %v2441_v51, 7 }
 0x1af   : > { %v1340_v47 = vrot.slane %v1335_v45, %v2210_v18  ;;  %v1344_v48 = vrot.slane %v1335_v45, %v2213_v19  ;;  %v1348_v55 = vrot.slane %v1335_v45, %v2216_v20  ;;  %v1352_v56 = vrot.slane %v1335_v45, %v2219_v21 }
 0x1b0   : > { %v1383_v57 = vmul.f32 %v1381_v46, %v2222_v22 }
 0x1b1   : > { %v1357_v36 = vsel %vm1230_vm0, %v1340_v47, 0.0  ;;  %v1358_v58 = vsel %vm1230_vm0, %v1344_v48, 0.0  ;;  %v1360_v37 = vsel %vm1230_vm0, %v1348_v55, 0.0  ;;  %v1362_v14 = vsel %vm1230_vm0, %v1352_v56, 0.0 }
 0x1b2   : > { %v1359_v38 = vadd.f32 %v1358_v58, %v1357_v36  ;;  %v1388_v40 = vrot.slane %v1383_v57, %v2225_v23  ;;  %v1392_v59 = vrot.slane %v1383_v57, %v2228_v24  ;;  %v1396_v60 = vrot.slane %v1383_v57, %v2231_v25 }
 0x1b3   : > { %v1400_v16 = vrot.slane %v1383_v57, %v2246_v29  ;;  %v1063_v56 = vstv %s360_s22  ;;  %v1053_v57 = vstv %s1806_s23  ;;  %s1658_s22 = scalar_lea.sflag [#allocation3], %s2582_s26  ;;  %s1937_s23 = scalar_lea.vmem %s1678_s16, 512 }
 0x1b4   : > { %v1361_v34 = vadd.f32 %v1360_v37, %v1359_v38  ;;  %v1406_v35 = vsel %vm1405_vm6, %v1388_v40, 0.0  ;;  %v1407_v33 = vsel %vm1405_vm6, %v1392_v59, 0.0  ;;  %v1409_v61 = vsel %vm1405_vm6, %v1396_v60, 0.0  ;;  %p1938_p10 = scmp.ne.s32.totalorder %s1678_s16, %s1937_s23 }
 0x1b5   : > { %v1408_v42 = vadd.f32 %v1407_v33, %v1406_v35  ;;  %v1411_v50 = vsel %vm1405_vm6, %v1400_v16, 0.0 }
 0x1b6   : > { %v1363_v43 = vadd.f32 %v1362_v14, %v1361_v34  ;;  %p1939_p11 = pnand %p1938_p10, %p2131_p5 }
 0x1b7   : > { %v1410_v1 = vadd.f32 %v1409_v61, %v1408_v42  ;;  %v1058_v42 = vstv %s1807_s24  ;;  %s2039_s24 = smov [#allocation5]  }
 0x1b8   : > { %1364 = vadd.xlane.f32.xlu0 %v1363_v43  ;;  %p1940_p12 = pneg %p1939_p11 }
 0x1b9   : > { %v1412_v63 = vadd.f32 %v1411_v50, %v1410_v1 }
 0x1bc   : > { %1413 = vadd.xlane.f32.xlu0 %v1412_v63 }
 0x267   : > { %v957_v49 = vpop.f32.mrf.mxu0  ;;  %v1028_v26 = vpop.f32.mrf.mxu1 }
 0x268   : > { %v958_v2 = vadd.f32 %v957_v49, %v886_v0  ;;  %v1029_v30 = vadd.f32 %v1028_v26, %v886_v0 }
 0x269   : > { %v959_v5 = vpop.f32.mrf.mxu0  ;;  %v1030_v6 = vpop.f32.mrf.mxu1 }
 0x26a   : > { %v1033_v39 = vsub.f32 0.0, %v958_v2  ;;  %v1035_v4 = vsub.f32 0.0, %v1029_v30  ;;  %v960_v7 = vadd.f32 %v959_v5, %v886_v0  ;;  %v1031_v8 = vadd.f32 %v1030_v6, %v886_v0  ;;  %v2833_v5 = vld [vmem:[#allocation12_spill] sm:$0xff] }
 0x26c   : > { %v1037_v10 = vmul.f32 1.442695, %v1033_v39  ;;  %v1041_v44 = vmul.f32 1.442695, %v1035_v4  ;;  %v1034_v15 = vsub.f32 0.0, %v960_v7  ;;  %v1036_v31 = vsub.f32 0.0, %v1031_v8 }
 0x26e   : > { %1903 = vpow2.f32 %v1037_v10  ;;  %v1039_v32 = vmul.f32 1.442695, %v1034_v15  ;;  %v1043_v41 = vmul.f32 1.442695, %v1036_v31  ;;  %v2514_v15 = vpop.xlane.xlu1 %1295 }
 0x26f   : > { %1905 = vpow2.f32 %v1041_v44 }
 0x270   : > { %1907 = vpow2.f32 %v1039_v32 }
 0x271   : > { %1909 = vpow2.f32 %v1043_v41 }
 0x27b   : > { %v1904_v3 = vpop.eup %1903 }
 0x27c   : > { %v1906_v52 = vpop.eup %1905  ;;  %v1045_v53 = vadd.f32 1.0, %v1904_v3 }
 0x27d   : > { %v1908_v54 = vpop.eup %1907  ;;  %v1047_v45 = vadd.f32 1.0, %v1906_v52 }
 0x27e   : > { %v1910_v47 = vpop.eup %1909  ;;  %1911 = vrcp.f32 %v1045_v53  ;;  %v1046_v48 = vadd.f32 1.0, %v1908_v54 }
 0x27f   : > { %1913 = vrcp.f32 %v1047_v45  ;;  %v1048_v55 = vadd.f32 1.0, %v1910_v47  ;;  %v2834_v45 = vld [vmem:[#allocation11_spill] sm:$0xff] }
 0x280   : > { %1915 = vrcp.f32 %v1046_v48 }
 0x281   : > { %1917 = vrcp.f32 %v1048_v55 }
 0x282   : > { %1919 = vrcp.f32 %v2514_v15 }
 0x28b   : > { %v1912_v36 = vpop.eup %1911 }
 0x28c   : > { %v1914_v58 = vpop.eup %1913  ;;  %v2465_v37 = vmul.f32 %v1912_v36, %v1063_v56  ;;  %v2467_v38 = vmul.f32 %v1912_v36, %v1053_v57  ;;  %v2503_v7 = vmul.f32 %v1912_v36, %v1058_v42 }
 0x28d   : > { %v1916_v40 = vpop.eup %1915  ;;  %v2469_v59 = vmul.f32 %v1914_v58, %v1063_v56  ;;  %v2471_v60 = vmul.f32 %v1914_v58, %v1053_v57  ;;  %v2505_v8 = vmul.f32 %v1914_v58, %v1058_v42 }
 0x28e   : > { %v1918_v14 = vpop.eup %1917  ;;  %v2473_v16 = vmul.f32 %v1916_v40, %v1063_v56  ;;  %v1297_v34 = vmul.f32 %v2417_v9, %v2465_v37  ;;  %v2477_v35 = vmul.f32 %v1916_v40, %v1053_v57  ;;  %v1367_v1 = vmul.f32 %v2417_v9, %v2467_v38 }
 0x28f   : > { %v2479_v33 = vmul.f32 %v1918_v14, %v1063_v56  ;;  %v2481_v61 = vmul.f32 %v1918_v14, %v1053_v57  ;;  %v1299_v50 = vmul.f32 %v2423_v12, %v2469_v59  ;;  %v1070_v26 = vmul.f32 %v2471_v60, %v2243_v28 }
 0x290   : > { %v1298_v43 = vmul.f32 %v2420_v11, %v2473_v16  ;;  %v1368_v63 = vmul.f32 %v2420_v11, %v2477_v35  ;;  %v1302_v0 = vsel %vm1301_vm7, %v1297_v34, 0.0  ;;  %v1069_v49 = vmul.f32 %v2477_v35, %v2239_v27  ;;  %v2835_v34 = vld [vmem:[#allocation13_spill] sm:$0xff] }
 0x291   : > { %v1300_v2 = vmul.f32 %v2426_v13, %v2479_v33  ;;  %v1071_v6 = vmul.f32 %v2481_v61, %v2833_v5  ;;  %v1369_v39 = vmul.f32 %v2423_v12, %v2471_v60  ;;  %v1305_v27 = vsel %vm1301_vm7, %v1299_v50, 0.0 }
 0x292   : > { %v1303_v30 = vsel %vm1301_vm7, %v1298_v43, 0.0  ;;  %v1370_v28 = vmul.f32 %v2426_v13, %v2481_v61  ;;  %v1371_v10 = vsel %vm1230_vm0, %v1367_v1, 0.0  ;;  %v1372_v44 = vsel %vm1230_vm0, %v1368_v63, 0.0  ;;  %v2836_v63 = vld [vmem:[#allocation15_spill] sm:$0xff] }
 0x293   : > { %v1304_v4 = vadd.f32 %v1303_v30, %v1302_v0  ;;  %v1077_v32 = vrot.slane %v1069_v49, 6  ;;  %v1078_v41 = vrot.slane %v1070_v26, 6  ;;  %v1373_v3 = vadd.f32 %v1372_v44, %v1371_v10  ;;  %v2837_v30 = vld [vmem:[#allocation14_spill] sm:$0xff] }
 0x294   : > { %v1307_v52 = vsel %vm1301_vm7, %v1300_v2, 0.0  ;;  %v1079_v53 = vrot.slane %v1071_v6, 6  ;;  %v1374_v54 = vsel %vm1230_vm0, %v1369_v39, 0.0  ;;  %v1068_v47 = vmul.f32 %v2467_v38, %v2834_v45 }
 0x295   : > { %v1306_v31 = vadd.f32 %v1305_v27, %v1304_v4  ;;  %v1375_v55 = vadd.f32 %v1374_v54, %v1373_v3  ;;  %v1376_v56 = vsel %vm1230_vm0, %v1370_v28, 0.0  ;;  %v2522_v36 = vmul.f32 %v1916_v40, %v1058_v42  ;;  %v2838_v40 = vld [vmem:[#allocation16_spill] sm:$0xff] }
 0x296   : > { %v1076_v57 = vrot.slane %v1068_v47, 6  ;;  %v2524_v58 = vmul.f32 %v1918_v14, %v1058_v42  ;;  %v1116_v43 = vmul.f32 %v2503_v7, %v2835_v34  ;;  %v1085_v50 = vsub.f32 %v2473_v16, %v1077_v32 }
 0x297   : > { %v1308_v48 = vadd.f32 %v1307_v52, %v1306_v31  ;;  %v1377_v1 = vadd.f32 %v1376_v56, %v1375_v55  ;;  %v1118_v0 = vmul.f32 %v2505_v8, %v2836_v63  ;;  %v1087_v2 = vsub.f32 %v2479_v33, %v1079_v53 }
 0x298   : > { %v1117_v5 = vmul.f32 %v2522_v36, %v2837_v30  ;;  %v1119_v14 = vmul.f32 %v2524_v58, %v2838_v40  ;;  %v1124_v42 = vrot.slane %v1116_v43, 1  ;;  %v1086_v39 = vsub.f32 %v2469_v59, %v1078_v41 }
 0x299   : > { %1309 = vadd.xlane.f32.xlu1 %v1308_v48  ;;  %1378 = vadd.xlane.f32.xlu0 %v1377_v1  ;;  %v1084_v4 = vsub.f32 %v2465_v37, %v1076_v57  ;;  %v2038_v27 = vmov 269488144   ;;  %v1126_v10 = vrot.slane %v1118_v0, 1  ;;  %v1088_v44 = vstv %s2508_s25  ;;  %s1941_s25 = sshll.u32 %s2039_s24, 4  ;;  %s1942_s25 = int_to_ptr.vmem [resolvable:$false] %s1941_s25 }
 0x29a   : > { %v1426_v28 = vunpack.c.l.s4 %v2038_v27  ;;  %v1125_v31 = vrot.slane %v1117_v5, 1  ;;  %v1127_v32 = vrot.slane %v1119_v14, 1  ;;  %v1132_v3 = vsub.f32 %v1068_v47, %v1124_v42  ;;  %v2542_v47 = vpop.eup %1919  ;;  %s1943_s27 = scalar_lea.vmem %s1942_s25, 1024  ;;  %p1944_p13 = scmp.lt.s32.totalorder %s1678_s16, %s1942_s25 }
 0x29b   : > { %v1134_v52 = vsub.f32 %v1070_v26, %v1126_v10  ;;  %v1090_v53 = vmul.f32 %v1088_v44, %v1085_v50  ;;  %v1092_v54 = vmul.f32 %v1088_v44, %v1087_v2  ;;  %v1091_v55 = vmul.f32 %v1088_v44, %v1086_v39  ;;  %v1365_v26 = vpop.xlane.xlu0 %1364  ;;  %p1945_p0 = scmp.lt.s32.totalorder %s1943_s27, %s1937_s23 }
 0x29c   : > { %v1133_v45 = vsub.f32 %v1069_v49, %v1125_v31  ;;  %v1135_v48 = vsub.f32 %v1071_v6, %v1127_v32  ;;  %v1089_v56 = vmul.f32 %v1088_v44, %v1084_v4  ;;  %v1427_v34 = vunpack.c.0.s8 %v1426_v28 }
 0x29d   : > { %v1136_v43 = vmul.f32 %v1132_v3, %v1088_v44  ;;  %v1138_v1 = vmul.f32 %v1134_v52, %v1088_v44  ;;  %v1098_v57 = vcombine.low %v1091_v55, %v1092_v54  ;;  %v2547_v50 = vmul.f32 %v2542_v47, %v1365_v26  ;;  %p1946_p1 = por %p1945_p0, %p1944_p13 }
 0x29e   : > { %v1137_v41 = vmul.f32 %v1133_v45, %v1088_v44  ;;  %v1139_v63 = vmul.f32 %v1135_v48, %v1088_v44  ;;  %v1097_v30 = vcombine.low %v1089_v56, %v1090_v53  ;;  %v2540_v5 = vsub.s32 %v1427_v34, %v2202_v17 }
 0x29f   : > { %v1112_v2 = vrot.slane %v1098_v57, %v2435_v62  ;;  %v1213_v44 = vrot.slane %v2481_v61, 5  ;;  %v1210_v32 = vrot.slane %v2467_v38, 5  ;;  %v1211_v3 = vrot.slane %v2477_v35, 5  ;;  %p1947_p2 = pnand %p1946_p1, %p1940_p12 }
 0x2a0   : > { %v1144_v40 = vcombine.low %v1136_v43, %v1137_v41  ;;  %v1145_v0 = vcombine.low %v1138_v1, %v1139_v63  ;;  %v1105_v14 = vrot.slane %v1097_v30, %v2435_v62  ;;  %v1431_v39 = vrot.slane %v2547_v50, %v2540_v5 }
 0x2a1   : > { %v1212_v52 = vrot.slane %v2471_v60, 5  ;;  %v1222_v34 = vrot.slane %v2503_v7, 5 }
 0x2a2   : > { %v1152_v49 = vrot.slane %v1144_v40, %v2435_v62  ;;  %v1159_v6 = vrot.slane %v1145_v0, %v2435_v62  ;;  %v1433_v4 = vsub.f32 %v2222_v22, %v1431_v39  ;;  %v1113_v27 = vcombine.high %v1105_v14, %v1112_v2 }
 0x2a4   : > { %v1160_v42 = vcombine.low %v1152_v49, %v1159_v6  ;;  %v2555_v28 = vmul.f32 %v1433_v4, %v2441_v51  ;;  %v1115_v62 = vadd.f32 %v1113_v27, %v2222_v22  ;;  %v1223_v49 = vrot.slane %v2522_v36, 5 }
 0x2a5   : > { %v1224_v6 = vrot.slane %v2505_v8, 5 }
 0x2a6   : > { %v1161_v17 = vrot.slane %v1160_v42, 7  ;;  %v1501_v31 = vmul.f32 %v2555_v28, %v2555_v28  ;;  %v1168_v30 = vrot.slane %v1115_v62, %v2210_v18  ;;  %v1172_v40 = vrot.slane %v1115_v62, %v2213_v19 }
 0x2a7   : > { %v1176_v0 = vrot.slane %v1115_v62, %v2216_v20  ;;  %v1180_v7 = vrot.slane %v1115_v62, %v2219_v21  ;;  %v1458_v51 = vrot.slane %v2555_v28, %v2210_v18 }
 0x2a8   : > { %v1163_v10 = vadd.f32 %v1161_v17, %v2222_v22  ;;  %v1506_v53 = vrot.slane %v1501_v31, %v2210_v18  ;;  %v1510_v54 = vrot.slane %v1501_v31, %v2213_v19  ;;  %v1514_v45 = vrot.slane %v1501_v31, %v2216_v20 }
 0x2a9   : > { %v1518_v48 = vrot.slane %v1501_v31, %v2219_v21  ;;  %v1225_v17 = vrot.slane %v2524_v58, 5 }
 0x2aa   : > { %v1189_v55 = vrot.slane %v1163_v10, %v2225_v23  ;;  %v1193_v22 = vrot.slane %v1163_v10, %v2228_v24  ;;  %v1197_v56 = vrot.slane %v1163_v10, %v2231_v25  ;;  %v1523_v43 = vsel %vm1230_vm0, %v1506_v53, 0.0 }
 0x2ab   : > { %v1524_v41 = vsel %vm1230_vm0, %v1510_v54, 0.0  ;;  %v1526_v1 = vsel %vm1230_vm0, %v1514_v45, 0.0  ;;  %v1201_v63 = vrot.slane %v1163_v10, %v2246_v29  ;;  %v1528_v26 = vsel %vm1230_vm0, %v1518_v48, 0.0 }
 0x2ac   : > { %v1525_v57 = vadd.f32 %v1524_v41, %v1523_v43  ;;  %v1231_v14 = vsel %vm1230_vm0, %v1168_v30, %v1189_v55  ;;  %v1232_v42 = vsel %vm1230_vm0, %v1172_v40, %v1193_v22  ;;  %v1233_v39 = vsel %vm1230_vm0, %v1176_v0, %v1197_v56  ;;  %v1414_v40 = vpop.xlane.xlu0 %1413 }
 0x2ad   : > { %v1234_v4 = vsel %vm1230_vm0, %v1180_v7, %v1201_v63  ;;  %v1236_v27 = vsel %vm1235_vm8, %v1231_v14, %v2465_v37  ;;  %v1237_v10 = vsel %vm1235_vm8, %v1232_v42, %v2473_v16  ;;  %v1238_v8 = vsel %vm1235_vm8, %v1233_v39, %v2469_v59  ;;  %v1921_v7 = vld [vmem:[%s2207_s21] sm:$0xff] }
 0x2ae   : > { %v1527_v2 = vadd.f32 %v1526_v1, %v1525_v57  ;;  %v1239_v31 = vsel %vm1235_vm8, %v1234_v4, %v2479_v33  ;;  %v1241_v62 = vsel %vm1240_vm9, %v1236_v27, %v1210_v32  ;;  %v1242_v58 = vsel %vm1240_vm9, %v1237_v10, %v1211_v3 }
 0x2af   : > { %v1243_v53 = vsel %vm1240_vm9, %v1238_v8, %v1212_v52  ;;  %v1244_v54 = vsel %vm1240_vm9, %v1239_v31, %v1213_v44  ;;  %v1246_v45 = vsel %vm1245_vm10, %v1241_v62, %v1222_v34  ;;  %v1247_v48 = vsel %vm1245_vm10, %v1242_v58, %v1223_v49 }
 0x2b0   : > { %v1529_v36 = vadd.f32 %v1528_v26, %v1527_v2  ;;  %v1248_v55 = vsel %vm1245_vm10, %v1243_v53, %v1224_v6  ;;  %v1249_v22 = vsel %vm1245_vm10, %v1244_v54, %v1225_v17  ;;  %v1251_v56 = vsel %vm1250_vm11, %v1246_v45, 0.0 }
 0x2b1   : > { %v1252_v32 = vsel %vm1250_vm11, %v1247_v48, 0.0  ;;  %v1253_v43 = vsel %vm1250_vm11, %v1248_v55, 0.0  ;;  %v1254_v3 = vsel %vm1250_vm11, %v1249_v22, 0.0  ;;  %v1256_v52 = vsel %vm1255_vm12, %v1251_v56, 0.0 }
 0x2b2   : > { %1530 = vadd.xlane.f32.xlu1 %v1529_v36  ;;  %v1257_v44 = vsel %vm1255_vm12, %v1252_v32, 0.0  ;;  %v1258_v34 = vsel %vm1255_vm12, %v1253_v43, 0.0  ;;  %v1259_v41 = vsel %vm1255_vm12, %v1254_v3, 0.0  ;;  %v1261_v1 = vsel %vm1260_vm13, %v1256_v52, 0.0 }
 0x2b3   : > { %v1262_v63 = vsel %vm1260_vm13, %v1257_v44, 0.0  ;;  %v1263_v57 = vsel %vm1260_vm13, %v1258_v34, 0.0  ;;  %v1264_v30 = vsel %vm1260_vm13, %v1259_v41, 0.0  ;;  %1265 = vst [vmem:[%s2621_s28] sm:$0xff] %v1261_v1  ;;  %v2628_v0 = vmul.f32 %v2542_v47, %v1414_v40 }
 0x2b4   : > { %1266 = vst [vmem:[%s2621_s28 + $0x8] sm:$0xff] %v1262_v63  ;;  %1267 = vst [vmem:[%s2621_s28 + $0x10] sm:$0xff] %v1263_v57  ;;  %v1466_v36 = vrot.slane %v2555_v28, %v2216_v20  ;;  %v1470_v8 = vrot.slane %v2555_v28, %v2219_v21 }
 0x2b5   : > { %1268 = vst [vmem:[%s2621_s28 + $0x18] sm:$0xff] %v1264_v30  ;;  %v1450_v26 = vrot.slane %v2628_v0, %v2540_v5 }
 0x2b7   : > { %v1452_v49 = vsub.f32 %v1921_v7, %v1450_v26 }
 0x2b9   : > { %v2635_v6 = vmul.f32 %v1452_v49, %v1381_v46  ;;  %v1462_v46 = vrot.slane %v2555_v28, %v2213_v19 }
 0x2bb   : > { %v1579_v2 = vmul.f32 %v2635_v6, %v2635_v6  ;;  %v1536_v31 = vrot.slane %v2635_v6, %v2225_v23  ;;  %v1540_v19 = vrot.slane %v2635_v6, %v2228_v24 }
 0x2bd   : > { %v1584_v14 = vrot.slane %v1579_v2, %v2225_v23  ;;  %v1588_v42 = vrot.slane %v1579_v2, %v2228_v24  ;;  %v1592_v39 = vrot.slane %v1579_v2, %v2231_v25  ;;  %v1596_v17 = vrot.slane %v1579_v2, %v2246_v29 }
 0x2be   : > { %v1544_v23 = vrot.slane %v2635_v6, %v2231_v25 }
 0x2bf   : > { %v1601_v4 = vsel %vm1405_vm6, %v1584_v14, 0.0  ;;  %v1602_v5 = vsel %vm1405_vm6, %v1588_v42, 0.0  ;;  %v1604_v53 = vsel %vm1405_vm6, %v1592_v39, 0.0  ;;  %v2660_v18 = vsel %vm1405_vm6, %v1596_v17, 0.0 }
 0x2c0   : > { %v1603_v58 = vadd.f32 %v1602_v5, %v1601_v4 }
 0x322   : > { %v1310_v27 = vpop.xlane.xlu1 %1309  ;;  %v1379_v62 = vpop.xlane.xlu0 %1378 }
 0x323   : > { %v2650_v10 = vmul.f32 %v2542_v47, %v1310_v27  ;;  %v2665_v54 = vmul.f32 %v2542_v47, %v1379_v62  ;;  %v1548_v47 = vrot.slane %v2635_v6, %v2246_v29 }
 0x325   : > { %v1416_v20 = vsub.f32 %v2465_v37, %v2650_v10  ;;  %v1417_v21 = vsub.f32 %v2473_v16, %v2650_v10  ;;  %v1611_v28 = vrot.slane %v2650_v10, 1  ;;  %v1418_v45 = vsub.f32 %v2469_v59, %v2650_v10 }
 0x326   : > { %v1419_v24 = vsub.f32 %v2479_v33, %v2650_v10  ;;  %v1435_v16 = vsub.f32 %v2467_v38, %v2665_v54  ;;  %v1436_v25 = vsub.f32 %v2477_v35, %v2665_v54  ;;  %v1437_v33 = vsub.f32 %v2471_v60, %v2665_v54 }
 0x327   : > { %v1420_v48 = vmul.f32 %v2417_v9, %v1416_v20  ;;  %v1421_v37 = vmul.f32 %v2420_v11, %v1417_v21  ;;  %v1422_v55 = vmul.f32 %v2423_v12, %v1418_v45  ;;  %v1438_v29 = vsub.f32 %v2481_v61, %v2665_v54 }
 0x328   : > { %v1423_v59 = vmul.f32 %v2426_v13, %v1419_v24  ;;  %v1439_v26 = vmul.f32 %v2417_v9, %v1435_v16  ;;  %v1440_v7 = vmul.f32 %v2420_v11, %v1436_v25  ;;  %v1441_v2 = vmul.f32 %v2423_v12, %v1437_v33 }
 0x329   : > { %v1475_v22 = vmul.f32 %v1458_v51, %v1420_v48  ;;  %v1476_v56 = vmul.f32 %v1462_v46, %v1421_v37  ;;  %v1488_v32 = vmul.f32 %v1420_v48, %v1420_v48  ;;  %v1489_v43 = vmul.f32 %v1421_v37, %v1421_v37 }
 0x32a   : > { %v1477_v3 = vmul.f32 %v1466_v36, %v1422_v55  ;;  %v1478_v52 = vmul.f32 %v1470_v8, %v1423_v59  ;;  %v1490_v38 = vmul.f32 %v1422_v55, %v1422_v55  ;;  %v1491_v44 = vmul.f32 %v1423_v59, %v1423_v59 }
 0x32b   : > { %v1479_v35 = vsel %vm1301_vm7, %v1475_v22, 0.0  ;;  %v1480_v34 = vsel %vm1301_vm7, %v1476_v56, 0.0  ;;  %v1492_v41 = vsel %vm1301_vm7, %v1488_v32, 0.0  ;;  %v1493_v1 = vsel %vm1301_vm7, %v1489_v43, 0.0 }
 0x32c   : > { %v1481_v60 = vadd.f32 %v1480_v34, %v1479_v35  ;;  %v1482_v63 = vsel %vm1301_vm7, %v1477_v3, 0.0  ;;  %v1484_v61 = vsel %vm1301_vm7, %v1478_v52, 0.0  ;;  %v1494_v57 = vadd.f32 %v1493_v1, %v1492_v41 }
 0x32d   : > { %v1495_v30 = vsel %vm1301_vm7, %v1490_v38, 0.0  ;;  %v1497_v40 = vsel %vm1301_vm7, %v1491_v44, 0.0  ;;  %v1442_v14 = vmul.f32 %v2426_v13, %v1438_v29  ;;  %v1566_v42 = vmul.f32 %v1439_v26, %v1439_v26 }
 0x32e   : > { %v1483_v49 = vadd.f32 %v1482_v63, %v1481_v60  ;;  %v1496_v6 = vadd.f32 %v1495_v30, %v1494_v57  ;;  %v1567_v39 = vmul.f32 %v1440_v7, %v1440_v7  ;;  %v1553_v17 = vmul.f32 %v1536_v31, %v1439_v26 }
 0x32f   : > { %v1554_v4 = vmul.f32 %v1540_v19, %v1440_v7  ;;  %v1605_v51 = vadd.f32 %v1604_v53, %v1603_v58  ;;  %v1568_v46 = vmul.f32 %v1441_v2, %v1441_v2  ;;  %v1569_v10 = vmul.f32 %v1442_v14, %v1442_v14 }
 0x330   : > { %v1485_v5 = vadd.f32 %v1484_v61, %v1483_v49  ;;  %v1498_v27 = vadd.f32 %v1497_v40, %v1496_v6  ;;  %v1570_v36 = vsel %vm1230_vm0, %v1566_v42, 0.0  ;;  %v1571_v9 = vsel %vm1230_vm0, %v1567_v39, 0.0 }
 0x331   : > { %v1555_v11 = vmul.f32 %v1544_v23, %v1441_v2  ;;  %v1613_v8 = vrot.slane %v2547_v50, 6  ;;  %v1572_v12 = vadd.f32 %v1571_v9, %v1570_v36  ;;  %v1557_v13 = vsel %vm1230_vm0, %v1553_v17, 0.0 }
 0x332   : > { %1486 = vadd.xlane.f32.xlu1 %v1485_v5  ;;  %1499 = vadd.xlane.f32.xlu0 %v1498_v27  ;;  %v1573_v31 = vsel %vm1230_vm0, %v1568_v46, 0.0  ;;  %v1558_v62 = vsel %vm1230_vm0, %v1554_v4, 0.0  ;;  %v1635_v58 = vsel %vm1230_vm0, %v2514_v15, %v1611_v28  ;;  %v1607_v53 = vadd.f32 %v2660_v18, %v1605_v51 }
 0x333   : > { %v1574_v19 = vadd.f32 %v1573_v31, %v1572_v12  ;;  %v1559_v20 = vadd.f32 %v1558_v62, %v1557_v13  ;;  %v1636_v21 = vsel %vm1235_vm8, %v1635_v58, %v1613_v8  ;;  %v1575_v50 = vsel %vm1230_vm0, %v1569_v10, 0.0 }
 0x334   : > { %v1556_v23 = vmul.f32 %v1548_v47, %v1442_v14  ;;  %v1560_v45 = vsel %vm1230_vm0, %v1555_v11, 0.0  ;;  %v1625_v29 = vrot.slane %v2665_v54, 2  ;;  %v1627_v22 = vrot.slane %v2628_v0, 2 }
 0x335   : > { %v1576_v24 = vadd.f32 %v1575_v50, %v1574_v19  ;;  %v1561_v48 = vadd.f32 %v1560_v45, %v1559_v20 }
 0x336   : > { %1608 = vadd.xlane.f32.xlu1 %v1607_v53  ;;  %v1562_v37 = vsel %vm1230_vm0, %v1556_v23, 0.0 }
 0x337   : > { %1577 = vadd.xlane.f32.xlu0 %v1576_v24  ;;  %v1563_v16 = vadd.f32 %v1562_v37, %v1561_v48 }
 0x33b   : > { %1564 = vadd.xlane.f32.xlu0 %v1563_v16  ;;  %v1531_v15 = vpop.xlane.xlu1 %1530 }
 0x33c   : > { %v1622_v59 = vrot.slane %v1531_v15, 3 }
 0x3bb   : > { %v1487_v28 = vpop.xlane.xlu1 %1486  ;;  %v1500_v18 = vpop.xlane.xlu0 %1499 }
 0x3bc   : > { %v1616_v25 = vrot.slane %v1487_v28, 7  ;;  %v1619_v55 = vrot.slane %v1500_v18, 6 }
 0x3be   : > { %v1637_v47 = vsel %vm1240_vm9, %v1636_v21, %v1616_v25 }
 0x3bf   : > { %v1638_v33 = vsel %vm1245_vm10, %v1637_v47, %v1619_v55  ;;  %v1609_v3 = vpop.xlane.xlu1 %1608 }
 0x3c0   : > { %v1639_v56 = vsel %vm1250_vm11, %v1638_v33, %v1622_v59  ;;  %v1578_v32 = vpop.xlane.xlu0 %1577  ;;  %v1633_v44 = vrot.slane %v1609_v3, 7 }
 0x3c1   : > { %v1640_v43 = vsel %vm1255_vm12, %v1639_v56, %v1625_v29  ;;  %v1630_v38 = vrot.slane %v1578_v32, 7 }
 0x3c2   : > { %v1641_v52 = vsel %vm1260_vm13, %v1640_v43, %v1627_v22 }
 0x3c3   : > { %1647 = vperm.xlu1 %1902, %v1641_v52  }
 0x3c4   : > { %v1565_v35 = vpop.xlane.xlu0 %1564 }
 0x3c5   : > { %v1642_v0 = vsel %vm1230_vm0, %v1565_v35, %v1630_v38 }
 0x3c6   : > { %v1643_v54 = vsel %vm1235_vm8, %v1642_v0, %v1633_v44 }
 0x3c7   : > { %1950 = shalt.err (!%p1947_p2)
}
 0x3c8   : > { %s1951_s17 = scalar_lea.hbm %s2729_s14, 512  ;;  %s1955_s29 = scalar_lea.hbm %s2809_s8, 1024 }
 0x3c9   : > { %p1952_p3 = scmp.ne.s32.totalorder %s2729_s14, %s1951_s17  ;;  %p1956_p8 = scmp.lt.s32.totalorder %s2729_s14, %s2809_s8 }
 0x3ca   : > { %p1957_p9 = scmp.lt.s32.totalorder %s1955_s29, %s1951_s17 }
 0x3cb   : > { %p1953_p4 = pnand %p1952_p3, %p2131_p5 }
 0x3cc   : > { %p1958_p10 = por %p1957_p9, %p1956_p8 }
 0x3cd   : > { %p1954_p7 = pneg %p1953_p4 }
 0x3cf   : > { %p1959_p11 = pnand %p1958_p10, %p1954_p7 }
 0x3d1   : > { %1962 = shalt.err (!%p1959_p11)
}
 0x3d2   : > { %1838 = dma.vmem_to_hbm [thread:$0]  (%p2131_p5), %s1678_s16, 512, %s2729_s14, %s1658_s22   ;;  %v1644_v34 = vsel %vm1240_vm9, %v1643_v54, 0.0 }
 0x3d3   : > { %1652 = vperm.xlu0 %1900, %v1644_v34   ;;  %s1803_s23 = sshll.u32 %s2582_s26, 4  ;;  %s1833_s27 = sshll.u32 %s2114_s13, 8 }
 0x3d4   : > { %s351_s25 = scalar_lea.vmem [#allocation6], %s1803_s23  ;;  %s2759_s21 = scalar_lea.hbm %s2810_s9, %s1833_s27 }
 0x3d5   : > { %s1690_s0 = sshll.u32 %s351_s25, 4  ;;  %s1663_s14 = scalar_lea.sflag [#allocation7], %s2582_s26  ;;  %s2754_s0 = int_to_ptr.vmem [resolvable:$true] %s1690_s0 }
 0x3d6   : > { %s1963_s16 = scalar_lea.vmem %s2754_s0, 256  ;;  %s2040_s22 = smov [#allocation6]  }
 0x3d7   : > { %p1964_p12 = scmp.ne.s32.totalorder %s2754_s0, %s1963_s16  ;;  %s1967_s13 = sshll.u32 %s2040_s22, 4  ;;  %s1968_s13 = int_to_ptr.vmem [resolvable:$false] %s1967_s13 }
 0x3d8   : > { %s1969_s29 = scalar_lea.vmem %s1968_s13, 512  ;;  %p1970_p1 = scmp.lt.s32.totalorder %s2754_s0, %s1968_s13 }
 0x3d9   : > { %p1965_p13 = pnand %p1964_p12, %p2131_p5  ;;  %p1971_p2 = scmp.lt.s32.totalorder %s1969_s29, %s1963_s16 }
 0x3db   : > { %p1966_p0 = pneg %p1965_p13  ;;  %p1972_p3 = por %p1971_p2, %p1970_p1 }
 0x3dd   : > { %p1973_p4 = pnand %p1972_p3, %p1966_p0 }
 0x43e   : > { %v1648_v41 = vpop.permute.xlu1 %1647 }
 0x43f   : > { %1655 = vst [vmem:[%s351_s25] sm:$0xff] %v1648_v41 }
 0x44e   : > { %v1653_v1 = vpop.permute.xlu0 %1652 }
 0x44f   : > { %1656 = vst [vmem:[%s351_s25 + $0x8] sm:$0xff] %v1653_v1 }
 0x450   : > { %1976 = shalt.err (!%p1973_p4)
}
 0x451   : > { %s1977_s24 = scalar_lea.hbm %s2759_s21, 256  ;;  %s1981_s27 = scalar_lea.hbm %s2810_s9, 512 }
 0x452   : > { %p1978_p7 = scmp.ne.s32.totalorder %s2759_s21, %s1977_s24  ;;  %p1982_p10 = scmp.lt.s32.totalorder %s2759_s21, %s2810_s9 }
 0x453   : > { %p1983_p11 = scmp.lt.s32.totalorder %s1981_s27, %s1977_s24 }
 0x454   : > { %p1979_p8 = pnand %p1978_p7, %p2131_p5 }
 0x455   : > { %p1984_p12 = por %p1983_p11, %p1982_p10 }
 0x456   : > { %p1980_p9 = pneg %p1979_p8 }
 0x458   : > { %p1985_p13 = pnand %p1984_p12, %p1980_p9 }
 0x45a   : > { %1988 = shalt.err (!%p1985_p13)
}
 0x45b   : > { %s2041_s16 = smov 128   ;;  %s2042_s22 = smov 8  }
 0x45c   : > { %1839 = dma.vmem_to_hbm [thread:$0]  (%p2131_p5), %s2754_s0, 256, %s2759_s21, %s1663_s14, %s2041_s16, %s2041_s16, %s2042_s22  }
 0x45d PF: > { %p1855_p0 = scmp.ge.s32.totalorder %s2031_s12, 2  ;;  %s1705_s13 = sand.u32 1, %s2019_s30  }
 0x45e   : > { %s1706_s29 = scalar_lea.sflag [#allocation3], %s1705_s13 }
 0x45f   : > { %p1847_p1 = pnand %p1855_p0, %p2135_p6 }
 0x461   : > { %p1848_p2 = pneg %p1847_p1 }
 0x463   : > { %2010 = dma.done.wait (%p1848_p2), %s1706_s29, 512  }
 0x464   : > { %2012 = vsyncadd (%p1848_p2), %s1706_s29, 4294966784  ;;  %s1715_s24 = scalar_lea.sflag [#allocation7], %s1705_s13 }
 0x465   : > { %2014 = dma.done.wait (%p1848_p2), %s1715_s24, 256  }
 0x466   : > { %2016 = vsyncadd (%p1848_p2), %s1715_s24, 4294967040  ;;  %p24_p5 = scmp.ge.s32.totalorder %s2118_s15, 4   ;;  %s2839_s30 = smov %s2023_s10 }
 0x467   : > { %s2840_s10 = smov %s2027_s11  ;;  %s2841_s11 = smov %s2129_s18 }
 0x468   : > { %s2842_s12 = smov %s2118_s15  ;;  %26 = sbr.rel (!%p24_p5) target bundleno = 8 (0x8), region = 109 }
 0x46d   :  { %1720 = vsyncpa [#allocation3], 1 }
 0x46e   :  { %1722 = vsyncpa [#allocation3 + $0x1], 1 }
 0x46f   :  { %1723 = vsyncpa [#allocation7], 1 }
 0x470   :  { %1725 = vsyncpa [#allocation7 + $0x1], 1 }
 0x471   :  { %1726 = vsyncpa [#allocation4], 1 }
 0x472   :  { %1728 = vsyncpa [#allocation4 + $0x1], 1 }

</bundles_post_ra>
